<compile_context>
chip_gen: v7x
topology: tpu7x:2x2x1
jax: 0.10.0
libtpu: 0.0.40
codegen_flags: <defaults>
</compile_context>

<pallas_src>
import jax
import jax.numpy as jnp
from jax.experimental import pallas as pl
from jax.experimental.pallas import tpu as pltpu


# ------------------------------ Pallas kernel -------------------------------

def _vae_kernel(x_ref, ew1q_ref, ew1s_ref, eb1_ref, ewh_ref, ebh_ref,
                dw1_ref, db1_ref, dwhq_ref, dwhs_ref, dbh_ref, eps_ref,
                xh_ref, zh_ref):
    """Fused VAE forward: encoder + reparameterization + decoder.

    Outputs (both lane-dense slabs, split in the JAX wrapper):
      xh_ref : (TB, 2*D_in) = [x_mu | x_logvar]
      zh_ref : (TB, 2*Lp)   = [z_mu(pad) | z_logvar(pad)]
    """
    bf16 = jnp.bfloat16
    f32 = jnp.float32

    # ---- encoder hidden layer (int8 weight, dequant via exact bf16 cast,
    #      per-output-channel scale folded in after the matmul) ----
    ew1 = ew1q_ref[...].astype(f32).astype(bf16)                   # exact: |q| <= 127
    h = jnp.dot(x_ref[...], ew1, preferred_element_type=f32)
    h = h * ew1s_ref[...] + eb1_ref[...]
    h = jnp.maximum(h, 0.0)                                        # ReLU (TB, H)

    # ---- fused mu/logvar encoder head: one (H, 2*Lp) matmul, lane-dense ----
    zh = jnp.dot(h.astype(bf16), ewh_ref[...],
                 preferred_element_type=f32) + ebh_ref[...]        # (TB, 2*Lp)
    Lp = ewh_ref.shape[1] // 2
    z_mu = zh[:, :Lp]                                              # clean vreg split
    z_lv = zh[:, Lp:]

    # ---- reparameterization (exp on EUP, stays in f32) ----
    z = z_mu + jnp.exp(0.5 * z_lv) * eps_ref[...]                  # (TB, Lp)

    # ---- decoder hidden layer (padded latent rows of dw1 are zero) ----
    hd = jnp.dot(z.astype(bf16), dw1_ref[...],
                 preferred_element_type=f32) + db1_ref[...]
    hd = jnp.maximum(hd, 0.0)                                      # ReLU (TB, H)

    # ---- fused mu/logvar decoder head: one (H, 2*D_in) int8 matmul ----
    dwh = dwhq_ref[...].astype(f32).astype(bf16)
    xh = jnp.dot(hd.astype(bf16), dwh, preferred_element_type=f32)
    xh = xh * dwhs_ref[...] + dbh_ref[...]                         # (TB, 2*D_in)

    xh_ref[...] = xh
    zh_ref[...] = zh


# ------------------------------ host wrappers --------------------------------

def _fused_vae_call(x2d, params, eps, tb):
    """x2d: (Bp, D_in) bf16; eps: (Bp, Lp) f32; Bp is a multiple of tb."""
    Bp, D_in = x2d.shape
    H = params["enc_w1_q"].shape[1]
    twoLp = params["enc_wh"].shape[1]
    Lp = twoLp // 2
    twoD = params["dec_whq"].shape[1]
    grid = (Bp // tb,)

    # Advisory cost estimate (computed from the padded shapes actually used).
    flops = 2 * Bp * (D_in * H + H * twoLp + Lp * H + H * twoD)
    param_bytes = sum(int(v.size) * v.dtype.itemsize for v in params.values())
    bytes_accessed = (int(x2d.size) * 2 + int(eps.size) * 4 + param_bytes
                      + Bp * twoD * 4 + Bp * twoLp * 4)
    cost = pl.CostEstimate(flops=int(flops), transcendentals=int(Bp * Lp),
                           bytes_accessed=int(bytes_accessed))

    # VMEM ask = actual (double-buffered) block footprint + headroom for the
    # in-kernel dequant intermediates, NOT the whole physical VMEM (v7x = 64 MiB).
    block_bytes = (tb * D_in * 2 + tb * Lp * 4          # x, eps tiles
                   + tb * twoD * 4 + tb * twoLp * 4     # output tiles
                   + param_bytes)                       # resident weights
    vmem_limit = int(min(2 * block_bytes + (8 << 20), 32 << 20))

    def wspec(arr):  # whole weight/bias resident across all grid steps
        return pl.BlockSpec(arr.shape, lambda i: (0, 0))

    in_specs = [
        pl.BlockSpec((tb, D_in), lambda i: (i, 0)),     # x tile
        wspec(params["enc_w1_q"]), wspec(params["enc_w1_s"]), wspec(params["enc_b1"]),
        wspec(params["enc_wh"]), wspec(params["enc_bh"]),
        wspec(params["dec_w1"]), wspec(params["dec_b1"]),
        wspec(params["dec_whq"]), wspec(params["dec_whs"]), wspec(params["dec_bh"]),
        pl.BlockSpec((tb, Lp), lambda i: (i, 0)),       # eps tile
    ]
    out_specs = (pl.BlockSpec((tb, twoD), lambda i: (i, 0)),
                 pl.BlockSpec((tb, twoLp), lambda i: (i, 0)))
    out_shape = (jax.ShapeDtypeStruct((Bp, twoD), jnp.float32),   # [x_mu | x_logvar]
                 jax.ShapeDtypeStruct((Bp, twoLp), jnp.float32))  # [z_mu | z_logvar] (padded)

    return pl.pallas_call(
        _vae_kernel,
        grid=grid,
        out_shape=out_shape,
        in_specs=in_specs,
        out_specs=out_specs,
        compiler_params=pltpu.CompilerParams(
            dimension_semantics=("parallel",),          # shards batch across v7x's 2 TCs
            vmem_limit_bytes=vmem_limit),
        cost_estimate=cost,
    )(x2d,
      params["enc_w1_q"], params["enc_w1_s"], params["enc_b1"],
      params["enc_wh"], params["enc_bh"],
      params["dec_w1"], params["dec_b1"],
      params["dec_whq"], params["dec_whs"], params["dec_bh"],
      eps)


def vae_forward(x_nchw, params, eps):
    """Mirrors VAE.forward: returns (x_mu, x_logvar, z_mu, z_logvar)."""
    B = x_nchw.shape[0]
    L = eps.shape[1]
    Lp = params["dec_w1"].shape[0]

    x2d = x_nchw.reshape(B, -1).astype(jnp.bfloat16)          # glue: flatten NCHW
    eps = jnp.pad(eps.astype(jnp.float32), ((0, 0), (0, Lp - L)))

    # Pad batch to a multiple of 16 sublanes (natural bf16 tile). For large B use
    # a 256-row batch tile so the grid pipelines and (on v7x) splits across TCs.
    # TODO(synk): on v5e prefer TB=128 (MXU is 4x128^2); 256 gains nothing there.
    Bp = max(16, -(-B // 16) * 16)
    if Bp > 256:
        tb = 256
        Bp = -(-Bp // tb) * tb
    else:
        tb = Bp
    if Bp != B:
        x2d = jnp.pad(x2d, ((0, Bp - B), (0, 0)))
        eps = jnp.pad(eps, ((0, Bp - B), (0, 0)))

    xh, zh = _fused_vae_call(x2d, params, eps, tb)

    D_in = xh.shape[1] // 2
    x_mu, x_logvar = xh[:B, :D_in], xh[:B, D_in:]
    z_mu, z_logvar = zh[:B, :L], zh[:B, Lp:Lp + L]
    return x_mu, x_logvar, z_mu, z_logvar


# ----------------------------- parameter setup -------------------------------

def _quantize_per_col(w):
    """Symmetric int8 quantization with per-output-channel scales."""
    amax = jnp.max(jnp.abs(w), axis=0, keepdims=True)
    scale = jnp.maximum(amax, 1e-8) / 127.0
    wq = jnp.round(w / scale).astype(jnp.int8)
    return wq, scale.astype(jnp.float32)


def init_params(key, d_in, hidden, latent, latent_pad=128):
    """PyTorch-Linear-style uniform init.

    - enc/dec mu & logvar head weights are concatenated so each head is a single
      lane-dense matmul; the encoder head (and eps / dec_w1) is zero-padded so the
      latent occupies a full 128-lane slab per half.
    - The two large matrices (enc_w1, dec_wh) are stored int8 + per-column scale;
      the small ones are bf16. Biases/scales stay f32.
    """
    def linear(k, fan_in, fan_out):
        kw, kb = jax.random.split(k)
        bound = 1.0 / jnp.sqrt(jnp.float32(fan_in))
        w = jax.random.uniform(kw, (fan_in, fan_out), jnp.float32, -bound, bound)
        b = jax.random.uniform(kb, (1, fan_out), jnp.float32, -bound, bound)
        return w, b

    keys = jax.random.split(key, 6)
    ew1, eb1 = linear(keys[0], d_in, hidden)
    ewm, ebm = linear(keys[1], hidden, latent)
    ewl, ebl = linear(keys[2], hidden, latent)
    dw1, db1 = linear(keys[3], latent, hidden)
    dwm, dbm = linear(keys[4], hidden, d_in)
    dwl, dbl = linear(keys[5], hidden, d_in)

    padc = latent_pad - latent
    zc_w = jnp.zeros((hidden, padc), jnp.float32)
    zc_b = jnp.zeros((1, padc), jnp.float32)

    ew1q, ew1s = _quantize_per_col(ew1)                              # (D_in,H) int8
    ewh = jnp.concatenate([ewm, zc_w, ewl, zc_w], axis=1).astype(jnp.bfloat16)  # (H, 2*Lp)
    ebh = jnp.concatenate([ebm, zc_b, ebl, zc_b], axis=1)                       # (1, 2*Lp)
    dw1p = jnp.concatenate([dw1, jnp.zeros((padc, hidden), jnp.float32)],
                           axis=0).astype(jnp.bfloat16)                         # (Lp, H)
    dwh = jnp.concatenate([dwm, dwl], axis=1)                                   # (H, 2*D_in)
    dwhq, dwhs = _quantize_per_col(dwh)
    dbh = jnp.concatenate([dbm, dbl], axis=1)

    return {
        "enc_w1_q": ew1q, "enc_w1_s": ew1s, "enc_b1": eb1,
        "enc_wh": ewh, "enc_bh": ebh,
        "dec_w1": dw1p, "dec_b1": db1,
        "dec_whq": dwhq, "dec_whs": dwhs, "dec_bh": dbh,
    }


# --------------------------- pure-JAX reference -------------------------------

def _ref_forward(x2d_bf16, params, eps_f32, latent):
    """Same quantized weights / bf16 inputs / f32 accumulation as the kernel."""
    bf16, f32 = jnp.bfloat16, jnp.float32
    Lp = params["dec_w1"].shape[0]
    eps_p = jnp.pad(eps_f32, ((0, 0), (0, Lp - latent)))

    ew1 = params["enc_w1_q"].astype(f32).astype(bf16)
    h = jnp.dot(x2d_bf16, ew1, preferred_element_type=f32)
    h = jnp.maximum(h * params["enc_w1_s"] + params["enc_b1"], 0.0)
    zh = jnp.dot(h.astype(bf16), params["enc_wh"],
                 preferred_element_type=f32) + params["enc_bh"]
    z_mu, z_lv = zh[:, :Lp], zh[:, Lp:]
    z = z_mu + jnp.exp(0.5 * z_lv) * eps_p
    hd = jnp.maximum(jnp.dot(z.astype(bf16), params["dec_w1"],
                             preferred_element_type=f32) + params["dec_b1"], 0.0)
    dwh = params["dec_whq"].astype(f32).astype(bf16)
    xh = jnp.dot(hd.astype(bf16), dwh, preferred_element_type=f32)
    xh = xh * params["dec_whs"] + params["dec_bh"]
    D = xh.shape[1] // 2
    return xh[:, :D], xh[:, D:], zh[:, :latent], zh[:, Lp:Lp + latent]


# ---------------------------------- main --------------------------------------

if __name__ == "__main__":
    B, C, H, W = 2, 4, 16, 16
    D_IN = C * H * W          # 1024
    HIDDEN = 128
    LATENT = 32

    root = jax.random.PRNGKey(0)
    k_x, k_eps, k_params = jax.random.split(root, 3)

    x = jax.random.normal(k_x, (B, C, H, W), dtype=jnp.float32)
    eps = jax.random.normal(k_eps, (B, LATENT), dtype=jnp.float32)  # reparam noise
    params = init_params(k_params, D_IN, HIDDEN, LATENT)

    x_mu, x_logvar, z_mu, z_logvar = jax.block_until_ready(
        vae_forward(x, params, eps))

    # Reference check (same quantized/bf16 weights & f32 accumulation as kernel).
    xm_r, xl_r, zm_r, zl_r = _ref_forward(
        x.reshape(B, -1).astype(jnp.bfloat16), params, eps, LATENT)

    assert x_mu.shape == (B, D_IN) and x_logvar.shape == (B, D_IN)
    assert z_mu.shape == (B, LATENT) and z_logvar.shape == (B, LATENT)
    assert jnp.allclose(z_mu, zm_r, atol=2e-2, rtol=2e-2)
    assert jnp.allclose(z_logvar, zl_r, atol=2e-2, rtol=2e-2)
    assert jnp.allclose(x_mu, xm_r, atol=2e-2, rtol=2e-2)
    assert jnp.allclose(x_logvar, xl_r, atol=2e-2, rtol=2e-2)

    print("KERNEL_OK")
</pallas_src>

<mosaic_0001>
module attributes {stable_mosaic.version = 11 : i64} {
  func.func @_vae_kernel(%arg0: i32, %arg1: memref<16x1024xbf16, #tpu.memory_space<vmem>>, %arg2: memref<1024x128xi8, #tpu.memory_space<vmem>>, %arg3: memref<1x128xf32, #tpu.memory_space<vmem>>, %arg4: memref<1x128xf32, #tpu.memory_space<vmem>>, %arg5: memref<128x256xbf16, #tpu.memory_space<vmem>>, %arg6: memref<1x256xf32, #tpu.memory_space<vmem>>, %arg7: memref<128x128xbf16, #tpu.memory_space<vmem>>, %arg8: memref<1x128xf32, #tpu.memory_space<vmem>>, %arg9: memref<128x2048xi8, #tpu.memory_space<vmem>>, %arg10: memref<1x2048xf32, #tpu.memory_space<vmem>>, %arg11: memref<1x2048xf32, #tpu.memory_space<vmem>>, %arg12: memref<16x128xf32, #tpu.memory_space<vmem>>, %arg13: memref<16x2048xf32, #tpu.memory_space<vmem>>, %arg14: memref<16x256xf32, #tpu.memory_space<vmem>>) attributes {dimension_semantics = [#tpu.dimension_semantics<parallel>], iteration_bounds = array<i64: 1>, scalar_prefetch = 0 : i64, scratch_operands = 0 : i64, tpu.core_type = #tpu.core_type<tc>, window_params = [{transform_indices = @transform_0, window_bounds = array<i64: 16, 1024>}, {pipeline_mode = #tpu.pipeline_mode<synchronous>, transform_indices = @transform_1, window_bounds = array<i64: 1024, 128>}, {pipeline_mode = #tpu.pipeline_mode<synchronous>, transform_indices = @transform_2, window_bounds = array<i64: 1, 128>}, {pipeline_mode = #tpu.pipeline_mode<synchronous>, transform_indices = @transform_3, window_bounds = array<i64: 1, 128>}, {pipeline_mode = #tpu.pipeline_mode<synchronous>, transform_indices = @transform_4, window_bounds = array<i64: 128, 256>}, {pipeline_mode = #tpu.pipeline_mode<synchronous>, transform_indices = @transform_5, window_bounds = array<i64: 1, 256>}, {pipeline_mode = #tpu.pipeline_mode<synchronous>, transform_indices = @transform_6, window_bounds = array<i64: 128, 128>}, {pipeline_mode = #tpu.pipeline_mode<synchronous>, transform_indices = @transform_7, window_bounds = array<i64: 1, 128>}, {pipeline_mode = #tpu.pipeline_mode<synchronous>, transform_indices = @transform_8, window_bounds = array<i64: 128, 2048>}, {pipeline_mode = #tpu.pipeline_mode<synchronous>, transform_indices = @transform_9, window_bounds = array<i64: 1, 2048>}, {pipeline_mode = #tpu.pipeline_mode<synchronous>, transform_indices = @transform_10, window_bounds = array<i64: 1, 2048>}, {transform_indices = @transform_11, window_bounds = array<i64: 16, 128>}, {transform_indices = @transform_12, window_bounds = array<i64: 16, 2048>}, {transform_indices = @transform_13, window_bounds = array<i64: 16, 256>}]} {
    %c0 = arith.constant 0 : index
    %c0_0 = arith.constant 0 : index
    %0 = vector.load %arg2[%c0, %c0_0] : memref<1024x128xi8, #tpu.memory_space<vmem>>, vector<1024x128xi8>
    %1 = arith.sitofp %0 : vector<1024x128xi8> to vector<1024x128xf32>
    %2 = arith.truncf %1 : vector<1024x128xf32> to vector<1024x128xbf16>
    %c0_1 = arith.constant 0 : index
    %c0_2 = arith.constant 0 : index
    %3 = vector.load %arg1[%c0_1, %c0_2] : memref<16x1024xbf16, #tpu.memory_space<vmem>>, vector<16x1024xbf16>
    %cst = arith.constant dense<0.000000e+00> : vector<16x128xf32>
    %4 = tpu.matmul %3, %2, %cst {dimension_numbers = #tpu.dot_dimension_numbers<[1], [0], [0], [1], [0, 0, 1, 1], [], []>} : vector<16x1024xbf16>, vector<1024x128xbf16>, vector<16x128xf32> -> vector<16x128xf32>
    %c0_3 = arith.constant 0 : index
    %c0_4 = arith.constant 0 : index
    %5 = vector.load %arg3[%c0_3, %c0_4] : memref<1x128xf32, #tpu.memory_space<vmem>>, vector<1x128xf32>
    %6 = vector.broadcast %5 : vector<1x128xf32> to vector<16x128xf32>
    %7 = arith.mulf %4, %6 : vector<16x128xf32>
    %c0_5 = arith.constant 0 : index
    %c0_6 = arith.constant 0 : index
    %8 = vector.load %arg4[%c0_5, %c0_6] : memref<1x128xf32, #tpu.memory_space<vmem>>, vector<1x128xf32>
    %9 = vector.broadcast %8 : vector<1x128xf32> to vector<16x128xf32>
    %10 = arith.addf %7, %9 : vector<16x128xf32>
    %cst_7 = arith.constant 0.000000e+00 : f32
    %11 = vector.broadcast %cst_7 : f32 to vector<16x128xf32>
    %12 = arith.maximumf %10, %11 : vector<16x128xf32>
    %13 = arith.truncf %12 : vector<16x128xf32> to vector<16x128xbf16>
    %c0_8 = arith.constant 0 : index
    %c0_9 = arith.constant 0 : index
    %14 = vector.load %arg5[%c0_8, %c0_9] : memref<128x256xbf16, #tpu.memory_space<vmem>>, vector<128x256xbf16>
    %cst_10 = arith.constant dense<0.000000e+00> : vector<16x256xf32>
    %15 = tpu.matmul %13, %14, %cst_10 {dimension_numbers = #tpu.dot_dimension_numbers<[1], [0], [0], [1], [0, 0, 1, 1], [], []>} : vector<16x128xbf16>, vector<128x256xbf16>, vector<16x256xf32> -> vector<16x256xf32>
    %c0_11 = arith.constant 0 : index
    %c0_12 = arith.constant 0 : index
    %16 = vector.load %arg6[%c0_11, %c0_12] : memref<1x256xf32, #tpu.memory_space<vmem>>, vector<1x256xf32>
    %17 = vector.broadcast %16 : vector<1x256xf32> to vector<16x256xf32>
    %18 = arith.addf %15, %17 : vector<16x256xf32>
    %19 = vector.extract_strided_slice %18 {offsets = [0, 0], sizes = [16, 128], strides = [1, 1]} : vector<16x256xf32> to vector<16x128xf32>
    %20 = vector.extract_strided_slice %18 {offsets = [0, 128], sizes = [16, 128], strides = [1, 1]} : vector<16x256xf32> to vector<16x128xf32>
    %cst_13 = arith.constant 5.000000e-01 : f32
    %21 = vector.broadcast %cst_13 : f32 to vector<16x128xf32>
    %22 = arith.mulf %21, %20 : vector<16x128xf32>
    %23 = math.exp %22 : vector<16x128xf32>
    %c0_14 = arith.constant 0 : index
    %c0_15 = arith.constant 0 : index
    %24 = vector.load %arg12[%c0_14, %c0_15] : memref<16x128xf32, #tpu.memory_space<vmem>>, vector<16x128xf32>
    %25 = arith.mulf %23, %24 : vector<16x128xf32>
    %26 = arith.addf %19, %25 : vector<16x128xf32>
    %27 = arith.truncf %26 : vector<16x128xf32> to vector<16x128xbf16>
    %c0_16 = arith.constant 0 : index
    %c0_17 = arith.constant 0 : index
    %28 = vector.load %arg7[%c0_16, %c0_17] : memref<128x128xbf16, #tpu.memory_space<vmem>>, vector<128x128xbf16>
    %cst_18 = arith.constant dense<0.000000e+00> : vector<16x128xf32>
    %29 = tpu.matmul %27, %28, %cst_18 {dimension_numbers = #tpu.dot_dimension_numbers<[1], [0], [0], [1], [0, 0, 1, 1], [], []>} : vector<16x128xbf16>, vector<128x128xbf16>, vector<16x128xf32> -> vector<16x128xf32>
    %c0_19 = arith.constant 0 : index
    %c0_20 = arith.constant 0 : index
    %30 = vector.load %arg8[%c0_19, %c0_20] : memref<1x128xf32, #tpu.memory_space<vmem>>, vector<1x128xf32>
    %31 = vector.broadcast %30 : vector<1x128xf32> to vector<16x128xf32>
    %32 = arith.addf %29, %31 : vector<16x128xf32>
    %cst_21 = arith.constant 0.000000e+00 : f32
    %33 = vector.broadcast %cst_21 : f32 to vector<16x128xf32>
    %34 = arith.maximumf %32, %33 : vector<16x128xf32>
    %c0_22 = arith.constant 0 : index
    %c0_23 = arith.constant 0 : index
    %35 = vector.load %arg9[%c0_22, %c0_23] : memref<128x2048xi8, #tpu.memory_space<vmem>>, vector<128x2048xi8>
    %36 = arith.sitofp %35 : vector<128x2048xi8> to vector<128x2048xf32>
    %37 = arith.truncf %36 : vector<128x2048xf32> to vector<128x2048xbf16>
    %38 = arith.truncf %34 : vector<16x128xf32> to vector<16x128xbf16>
    %cst_24 = arith.constant dense<0.000000e+00> : vector<16x2048xf32>
    %39 = tpu.matmul %38, %37, %cst_24 {dimension_numbers = #tpu.dot_dimension_numbers<[1], [0], [0], [1], [0, 0, 1, 1], [], []>} : vector<16x128xbf16>, vector<128x2048xbf16>, vector<16x2048xf32> -> vector<16x2048xf32>
    %c0_25 = arith.constant 0 : index
    %c0_26 = arith.constant 0 : index
    %40 = vector.load %arg10[%c0_25, %c0_26] : memref<1x2048xf32, #tpu.memory_space<vmem>>, vector<1x2048xf32>
    %41 = vector.broadcast %40 : vector<1x2048xf32> to vector<16x2048xf32>
    %42 = arith.mulf %39, %41 : vector<16x2048xf32>
    %c0_27 = arith.constant 0 : index
    %c0_28 = arith.constant 0 : index
    %43 = vector.load %arg11[%c0_27, %c0_28] : memref<1x2048xf32, #tpu.memory_space<vmem>>, vector<1x2048xf32>
    %44 = vector.broadcast %43 : vector<1x2048xf32> to vector<16x2048xf32>
    %45 = arith.addf %42, %44 : vector<16x2048xf32>
    %c0_29 = arith.constant 0 : index
    %c0_30 = arith.constant 0 : index
    %46 = vector.load %arg13[%c0_29, %c0_30] : memref<16x2048xf32, #tpu.memory_space<vmem>>, vector<16x2048xf32>
    tpu.vector_store %arg13[%c0_29, %c0_30], %45 {strides = array<i32>} : memref<16x2048xf32, #tpu.memory_space<vmem>>, vector<16x2048xf32>,
    %c0_31 = arith.constant 0 : index
    %c0_32 = arith.constant 0 : index
    %47 = vector.load %arg14[%c0_31, %c0_32] : memref<16x256xf32, #tpu.memory_space<vmem>>, vector<16x256xf32>
    tpu.vector_store %arg14[%c0_31, %c0_32], %18 {strides = array<i32>} : memref<16x256xf32, #tpu.memory_space<vmem>>, vector<16x256xf32>,
    return
  }
  func.func @transform_0(%arg0: i32) -> (i32, i32) {
    %c0_i32 = arith.constant 0 : i32
    %c0_i32_0 = arith.constant 0 : i32
    return %arg0, %c0_i32 : i32, i32
  }
  func.func @transform_1(%arg0: i32) -> (i32, i32) {
    %c0_i32 = arith.constant 0 : i32
    %c0_i32_0 = arith.constant 0 : i32
    %c0_i32_1 = arith.constant 0 : i32
    return %c0_i32, %c0_i32_0 : i32, i32
  }
  func.func @transform_2(%arg0: i32) -> (i32, i32) {
    %c0_i32 = arith.constant 0 : i32
    %c0_i32_0 = arith.constant 0 : i32
    %c0_i32_1 = arith.constant 0 : i32
    return %c0_i32, %c0_i32_0 : i32, i32
  }
  func.func @transform_3(%arg0: i32) -> (i32, i32) {
    %c0_i32 = arith.constant 0 : i32
    %c0_i32_0 = arith.constant 0 : i32
    %c0_i32_1 = arith.constant 0 : i32
    return %c0_i32, %c0_i32_0 : i32, i32
  }
  func.func @transform_4(%arg0: i32) -> (i32, i32) {
    %c0_i32 = arith.constant 0 : i32
    %c0_i32_0 = arith.constant 0 : i32
    %c0_i32_1 = arith.constant 0 : i32
    return %c0_i32, %c0_i32_0 : i32, i32
  }
  func.func @transform_5(%arg0: i32) -> (i32, i32) {
    %c0_i32 = arith.constant 0 : i32
    %c0_i32_0 = arith.constant 0 : i32
    %c0_i32_1 = arith.constant 0 : i32
    return %c0_i32, %c0_i32_0 : i32, i32
  }
  func.func @transform_6(%arg0: i32) -> (i32, i32) {
    %c0_i32 = arith.constant 0 : i32
    %c0_i32_0 = arith.constant 0 : i32
    %c0_i32_1 = arith.constant 0 : i32
    return %c0_i32, %c0_i32_0 : i32, i32
  }
  func.func @transform_7(%arg0: i32) -> (i32, i32) {
    %c0_i32 = arith.constant 0 : i32
    %c0_i32_0 = arith.constant 0 : i32
    %c0_i32_1 = arith.constant 0 : i32
    return %c0_i32, %c0_i32_0 : i32, i32
  }
  func.func @transform_8(%arg0: i32) -> (i32, i32) {
    %c0_i32 = arith.constant 0 : i32
    %c0_i32_0 = arith.constant 0 : i32
    %c0_i32_1 = arith.constant 0 : i32
    return %c0_i32, %c0_i32_0 : i32, i32
  }
  func.func @transform_9(%arg0: i32) -> (i32, i32) {
    %c0_i32 = arith.constant 0 : i32
    %c0_i32_0 = arith.constant 0 : i32
    %c0_i32_1 = arith.constant 0 : i32
    return %c0_i32, %c0_i32_0 : i32, i32
  }
  func.func @transform_10(%arg0: i32) -> (i32, i32) {
    %c0_i32 = arith.constant 0 : i32
    %c0_i32_0 = arith.constant 0 : i32
    %c0_i32_1 = arith.constant 0 : i32
    return %c0_i32, %c0_i32_0 : i32, i32
  }
  func.func @transform_11(%arg0: i32) -> (i32, i32) {
    %c0_i32 = arith.constant 0 : i32
    %c0_i32_0 = arith.constant 0 : i32
    return %arg0, %c0_i32 : i32, i32
  }
  func.func @transform_12(%arg0: i32) -> (i32, i32) {
    %c0_i32 = arith.constant 0 : i32
    %c0_i32_0 = arith.constant 0 : i32
    return %arg0, %c0_i32 : i32, i32
  }
  func.func @transform_13(%arg0: i32) -> (i32, i32) {
    %c0_i32 = arith.constant 0 : i32
    %c0_i32_0 = arith.constant 0 : i32
    return %arg0, %c0_i32 : i32, i32
  }
}

</mosaic_0001>

<bundles_post_ra>
// kernel: tpu_custom_call.1
= control target key start
LH: loop header
LB: loop body
LE: loop exit
PB: predicated region body
PF: predicated region fallthrough
CT: control target
= control target key end

     0   :  { %19 = vsyncpa [#allocation3], 0  ;;  %s2471_s0 = inlined_call_operand.hbm [shape: bf16[16,1024], index: 0, kind: input, shape index: {}]   ;;  %s2472_s1 = inlined_call_operand.hbm [shape: s8[1024,128], index: 1, kind: input, shape index: {}]   ;;  %s2473_s2 = inlined_call_operand.hbm [shape: f32[1,128], index: 2, kind: input, shape index: {}]   ;;  %s2474_s3 = inlined_call_operand.hbm [shape: f32[1,128], index: 3, kind: input, shape index: {}]   ;;  %s2475_s4 = inlined_call_operand.hbm [shape: bf16[128,256], index: 4, kind: input, shape index: {}]   ;;  %s2476_s5 = inlined_call_operand.vmem [shape: f32[1,256], index: 5, kind: input, shape index: {}]   ;;  %s2477_s6 = inlined_call_operand.hbm [shape: bf16[128,128], index: 6, kind: input, shape index: {}]   ;;  %s2478_s7 = inlined_call_operand.hbm [shape: f32[1,128], index: 7, kind: input, shape index: {}]   ;;  %s2479_s8 = inlined_call_operand.hbm [shape: s8[128,2048], index: 8, kind: input, shape index: {}]   ;;  %s2480_s9 = inlined_call_operand.vmem [shape: f32[1,2048], index: 9, kind: input, shape index: {}]   ;;  %s2481_s10 = inlined_call_operand.vmem [shape: f32[1,2048], index: 10, kind: input, shape index: {}]   ;;  %s2482_s11 = inlined_call_operand.hbm [shape: f32[16,128], index: 11, kind: input, shape index: {}]   ;;  %s2483_s12 = inlined_call_operand.hbm [shape: f32[16,2048], index: 12, kind: output, shape index: {0}]   ;;  %s2484_s13 = inlined_call_operand.hbm [shape: f32[16,256], index: 13, kind: output, shape index: {1}]  }
   0x1   :  { %20 = vsyncpa [#allocation6], 0 }
   0x2   :  { %21 = vsyncpa [#allocation9], 0 }
   0x3   :  { %22 = vsyncpa [#allocation12], 0 }
   0x4   :  { %23 = vsyncpa [#allocation15], 0 }
   0x5   :  { %24 = vsyncpa [#allocation4], 0 }
   0x6   :  { %25 = vsyncpa [#allocation19], 0  ;;  %s2078_s25 = smov [#allocation5]   ;;  %s1822_s29 = scalar_lea.hbm %s2472_s1, 4096 }
   0x7   :  { %s43_s26 = sshll.u32 %s2078_s25, 4  ;;  %p1823_p0 = scmp.ne.s32.totalorder %s2472_s1, %s1822_s29  ;;  %s44_s26 = int_to_ptr.vmem [resolvable:$true] %s43_s26 }
   0x8   :  { %p1826_p1 = scmp.lt.u32.totalorder %s1822_s29, %s2472_s1 }
   0xa   :  { %p1828_p2 = pnand %p1826_p1, %p1823_p0 }
   0xc   :  { %1831 = shalt.err (!%p1828_p2)
}
   0xd   :  { %s1832_s17 = scalar_lea.vmem %s44_s26, 4096  ;;  %p1837_p4 = scmp.lt.s32.totalorder %s44_s26, %s44_s26 }
   0xe   :  { %p1833_p3 = scmp.ne.s32.totalorder %s44_s26, %s1832_s17  ;;  %p1838_p5 = scmp.lt.s32.totalorder %s1832_s17, %s1832_s17 }
  0x10   :  { %p1839_p6 = por %p1838_p5, %p1837_p4 }
  0x12   :  { %p1840_p7 = pnand %p1839_p6, %p1833_p3 }
  0x14   :  { %1843 = shalt.err (!%p1840_p7)
}
  0x15   :  { %s2079_s18 = smov 128   ;;  %s2080_s19 = smov 8  }
  0x16   :  { %49 = dma.hbm_to_vmem [thread:$0]  %s2472_s1, 4096, %s44_s26, [#allocation6], %s2079_s18, %s2079_s18, %s2080_s19  }
  0x17   :  { %s2081_s22 = smov [#allocation8]   ;;  %s2082_s24 = smov [#allocation11]  }
  0x18   :  { %s66_s23 = sshll.u32 %s2081_s22, 4  ;;  %s89_s25 = sshll.u32 %s2082_s24, 4  ;;  %s67_s23 = int_to_ptr.vmem [resolvable:$true] %s66_s23  ;;  %s90_s25 = int_to_ptr.vmem [resolvable:$true] %s89_s25 }
  0x19   :  { %s1844_s29 = scalar_lea.hbm %s2474_s3, 16 }
  0x1a   :  { %p1845_p8 = scmp.ne.s32.totalorder %s2474_s3, %s1844_s29  ;;  %p1848_p9 = scmp.lt.u32.totalorder %s1844_s29, %s2474_s3 }
  0x1c   :  { %p1850_p10 = pnand %p1848_p9, %p1845_p8 }
  0x1e   :  { %1853 = shalt.err (!%p1850_p10)
}
  0x1f   :  { %s1854_s1 = scalar_lea.vmem %s67_s23, 16  ;;  %s1858_s26 = scalar_lea.vmem %s67_s23, 32 }
  0x20   :  { %p1855_p11 = scmp.ne.s32.totalorder %s67_s23, %s1854_s1  ;;  %p1859_p12 = scmp.lt.s32.totalorder %s67_s23, %s67_s23 }
  0x21   :  { %p1860_p13 = scmp.lt.s32.totalorder %s1858_s26, %s1854_s1 }
  0x23   :  { %p1861_p0 = por %p1860_p13, %p1859_p12 }
  0x25   :  { %p1862_p1 = pnand %p1861_p0, %p1855_p11 }
  0x27   :  { %1865 = shalt.err (!%p1862_p1)
}
  0x28   :  { %69 = dma.hbm_to_vmem [thread:$0]  %s2474_s3, 16, %s67_s23, [#allocation9]  }
  0x29   :  { %s1866_s24 = scalar_lea.hbm %s2477_s6, 1024 }
  0x2a   :  { %p1867_p2 = scmp.ne.s32.totalorder %s2477_s6, %s1866_s24  ;;  %p1870_p3 = scmp.lt.u32.totalorder %s1866_s24, %s2477_s6 }
  0x2c   :  { %p1872_p4 = pnand %p1870_p3, %p1867_p2 }
  0x2e   :  { %1875 = shalt.err (!%p1872_p4)
}
  0x2f   :  { %s1876_s14 = scalar_lea.vmem %s90_s25, 1024  ;;  %p1881_p6 = scmp.lt.s32.totalorder %s90_s25, %s90_s25 }
  0x30   :  { %p1877_p5 = scmp.ne.s32.totalorder %s90_s25, %s1876_s14  ;;  %p1882_p7 = scmp.lt.s32.totalorder %s1876_s14, %s1876_s14 }
  0x32   :  { %p1883_p8 = por %p1882_p7, %p1881_p6 }
  0x34   :  { %p1884_p9 = pnand %p1883_p8, %p1877_p5 }
  0x36   :  { %1887 = shalt.err (!%p1884_p9)
}
  0x37   :  { %s2083_s3 = smov 64   ;;  %s2084_s23 = smov 4  }
  0x38   :  { %95 = dma.hbm_to_vmem [thread:$0]  %s2477_s6, 1024, %s90_s25, [#allocation12], %s2083_s3, %s2083_s3, %s2084_s23  }
  0x39   :  { %s2085_s1 = smov [#allocation14]   ;;  %s1888_s21 = scalar_lea.hbm %s2479_s8, 8192 }
  0x3a   :  { %s111_s26 = sshll.u32 %s2085_s1, 4  ;;  %p1889_p10 = scmp.ne.s32.totalorder %s2479_s8, %s1888_s21  ;;  %s112_s26 = int_to_ptr.vmem [resolvable:$true] %s111_s26 }
  0x3b   :  { %p1892_p11 = scmp.lt.u32.totalorder %s1888_s21, %s2479_s8 }
  0x3d   :  { %p1894_p12 = pnand %p1892_p11, %p1889_p10 }
  0x3f   :  { %1897 = shalt.err (!%p1894_p12)
}
  0x40   :  { %s1898_s29 = scalar_lea.vmem %s112_s26, 8192  ;;  %p1903_p0 = scmp.lt.s32.totalorder %s112_s26, %s112_s26 }
  0x41   :  { %p1899_p13 = scmp.ne.s32.totalorder %s112_s26, %s1898_s29  ;;  %p1904_p1 = scmp.lt.s32.totalorder %s1898_s29, %s1898_s29 }
  0x43   :  { %p1905_p2 = por %p1904_p1, %p1903_p0 }
  0x45   :  { %p1906_p3 = pnand %p1905_p2, %p1899_p13 }
  0x47   :  { %1909 = shalt.err (!%p1906_p3)
}
  0x48   :  { %s2086_s6 = smov 2048   ;;  %s2087_s14 = smov [#allocation2]  }
  0x49   :  { %117 = dma.hbm_to_vmem [thread:$0]  %s2479_s8, 8192, %s112_s26, [#allocation15], %s2086_s6, %s2086_s6, %s2079_s18  }
  0x4a   :  { %s31_s3 = sshll.u32 %s2087_s14, 4  ;;  %s1910_s16 = scalar_lea.hbm %s2471_s0, 1024  ;;  %s32_s3 = int_to_ptr.vmem [resolvable:$true] %s31_s3 }
  0x4b   :  { %p1911_p4 = scmp.ne.s32.totalorder %s2471_s0, %s1910_s16  ;;  %p1914_p5 = scmp.lt.u32.totalorder %s1910_s16, %s2471_s0 }
  0x4d   :  { %p1916_p6 = pnand %p1914_p5, %p1911_p4 }
  0x4f   :  { %1919 = shalt.err (!%p1916_p6)
}
  0x50   :  { %s1920_s22 = scalar_lea.vmem %s32_s3, 1024  ;;  %p1925_p8 = scmp.lt.s32.totalorder %s32_s3, %s32_s3 }
  0x51   :  { %p1921_p7 = scmp.ne.s32.totalorder %s32_s3, %s1920_s22  ;;  %p1926_p9 = scmp.lt.s32.totalorder %s1920_s22, %s1920_s22 }
  0x53   :  { %p1927_p10 = por %p1926_p9, %p1925_p8 }
  0x55   :  { %p1928_p11 = pnand %p1927_p10, %p1921_p7 }
  0x57   :  { %1931 = shalt.err (!%p1928_p11)
}
  0x58   :  { %s2088_s8 = smov 512   ;;  %s2089_s26 = smov 32  }
  0x59   :  { %37 = dma.hbm_to_vmem [thread:$0]  %s2471_s0, 1024, %s32_s3, [#allocation3], %s2088_s8, %s2088_s8, %s2089_s26  }
  0x5a   :  { %s2090_s28 = smov [#allocation7]   ;;  %s2091_s25 = smov [#allocation10]  }
  0x5b   :  { %s56_s29 = sshll.u32 %s2090_s28, 4  ;;  %s75_s30 = sshll.u32 %s2091_s25, 4  ;;  %s57_s29 = int_to_ptr.vmem [resolvable:$true] %s56_s29  ;;  %s2237_s30 = int_to_ptr.vmem [resolvable:$true] %s75_s30 }
  0x5c   :  { %s1932_s15 = scalar_lea.hbm %s2473_s2, 16 }
  0x5d   :  { %p1933_p12 = scmp.ne.s32.totalorder %s2473_s2, %s1932_s15  ;;  %p1936_p13 = scmp.lt.u32.totalorder %s1932_s15, %s2473_s2 }
  0x5f   :  { %p1938_p0 = pnand %p1936_p13, %p1933_p12 }
  0x61   :  { %1941 = shalt.err (!%p1938_p0)
}
  0x62   :  { %s1942_s0 = scalar_lea.vmem %s57_s29, 16  ;;  %s1946_s3 = scalar_lea.vmem %s57_s29, 32 }
  0x63   :  { %p1943_p1 = scmp.ne.s32.totalorder %s57_s29, %s1942_s0  ;;  %p1947_p2 = scmp.lt.s32.totalorder %s57_s29, %s57_s29 }
  0x64   :  { %p1948_p3 = scmp.lt.s32.totalorder %s1946_s3, %s1942_s0 }
  0x66   :  { %p1949_p4 = por %p1948_p3, %p1947_p2 }
  0x68   :  { %p1950_p5 = pnand %p1949_p4, %p1943_p1 }
  0x6a   :  { %1953 = shalt.err (!%p1950_p5)
}
  0x6b   :  { %59 = dma.hbm_to_vmem [thread:$0]  %s2473_s2, 16, %s57_s29, [#allocation6]  }
  0x6c   :  { %s1954_s24 = scalar_lea.hbm %s2475_s4, 2048 }
  0x6d   :  { %p1955_p6 = scmp.ne.s32.totalorder %s2475_s4, %s1954_s24  ;;  %p1958_p7 = scmp.lt.u32.totalorder %s1954_s24, %s2475_s4 }
  0x6f   :  { %p1960_p8 = pnand %p1958_p7, %p1955_p6 }
  0x71   :  { %1963 = shalt.err (!%p1960_p8)
}
  0x72   :  { %s1964_s23 = scalar_lea.vmem %s2237_s30, 2048  ;;  %p1969_p10 = scmp.lt.s32.totalorder %s2237_s30, %s2237_s30 }
  0x73   :  { %p1965_p9 = scmp.ne.s32.totalorder %s2237_s30, %s1964_s23  ;;  %p1970_p11 = scmp.lt.s32.totalorder %s1964_s23, %s1964_s23 }
  0x75   :  { %p1971_p12 = por %p1970_p11, %p1969_p10 }
  0x77   :  { %p1972_p13 = pnand %p1971_p12, %p1965_p9 }
  0x79   :  { %1975 = shalt.err (!%p1972_p13)
}
  0x7a   :  { %81 = dma.hbm_to_vmem [thread:$0]  %s2475_s4, 2048, %s2237_s30, [#allocation9], %s2079_s18, %s2079_s18, %s2080_s19  }
  0x7b   :  { %s2092_s15 = smov [#allocation13]   ;;  %s2093_s1 = smov [#allocation16]  }
  0x7c   :  { %s102_s16 = sshll.u32 %s2092_s15, 4  ;;  %s127_s17 = sshll.u32 %s2093_s1, 4  ;;  %s103_s16 = int_to_ptr.vmem [resolvable:$true] %s102_s16  ;;  %s2271_s17 = int_to_ptr.vmem [resolvable:$true] %s127_s17 }
  0x7d   :  { %s1976_s3 = scalar_lea.hbm %s2478_s7, 16 }
  0x7e   :  { %p1977_p0 = scmp.ne.s32.totalorder %s2478_s7, %s1976_s3  ;;  %p1980_p1 = scmp.lt.u32.totalorder %s1976_s3, %s2478_s7 }
  0x80   :  { %p1982_p2 = pnand %p1980_p1, %p1977_p0 }
  0x82   :  { %1985 = shalt.err (!%p1982_p2)
}
  0x83   :  { %s1986_s4 = scalar_lea.vmem %s103_s16, 16  ;;  %s1990_s30 = scalar_lea.vmem %s103_s16, 32 }
  0x84   :  { %p1987_p3 = scmp.ne.s32.totalorder %s103_s16, %s1986_s4  ;;  %p1991_p4 = scmp.lt.s32.totalorder %s103_s16, %s103_s16 }
  0x85   :  { %p1992_p5 = scmp.lt.s32.totalorder %s1990_s30, %s1986_s4 }
  0x87   :  { %p1993_p6 = por %p1992_p5, %p1991_p4 }
  0x89   :  { %p1994_p7 = pnand %p1993_p6, %p1987_p3 }
  0x8b   :  { %1997 = shalt.err (!%p1994_p7)
}
  0x8c   :  { %105 = dma.hbm_to_vmem [thread:$0]  %s2478_s7, 16, %s103_s16, [#allocation12]  }
  0x8d   :  { %s1998_s14 = scalar_lea.hbm %s2482_s11, 256 }
  0x8e   :  { %p1999_p8 = scmp.ne.s32.totalorder %s2482_s11, %s1998_s14  ;;  %p2002_p9 = scmp.lt.u32.totalorder %s1998_s14, %s2482_s11 }
  0x90   :  { %p2004_p10 = pnand %p2002_p9, %p1999_p8 }
  0x92   :  { %2007 = shalt.err (!%p2004_p10)
}
  0x93   :  { %s2008_s1 = scalar_lea.vmem %s2271_s17, 256  ;;  %p2013_p12 = scmp.lt.s32.totalorder %s2271_s17, %s2271_s17 }
  0x94   :  { %p2009_p11 = scmp.ne.s32.totalorder %s2271_s17, %s2008_s1  ;;  %p2014_p13 = scmp.lt.s32.totalorder %s2008_s1, %s2008_s1 }
  0x96   :  { %p2015_p0 = por %p2014_p13, %p2013_p12 }
  0x98   :  { %p2016_p1 = pnand %p2015_p0, %p2009_p11 }
  0x9a   :  { %2019 = shalt.err (!%p2016_p1)
}
  0x9b   :  { %133 = dma.hbm_to_vmem [thread:$0]  %s2482_s11, 256, %s2271_s17, [#allocation15], %s2079_s18, %s2079_s18, %s2080_s19  }
  0x9c   :  { %2064 = dma.done.wait [#allocation3], 1024  }
  0x9d   :  { %2065 = vsyncadd [#allocation3], 4294966272 }
  0x9e   :  { %2066 = dma.done.wait [#allocation6], 4112  }
  0x9f   :  { %2067 = vsyncadd [#allocation6], 4294963184 }
  0xa0   :  { %2068 = dma.done.wait [#allocation9], 2064  }
  0xa1   :  { %2069 = vsyncadd [#allocation9], 4294965232 }
  0xa2   :  { %2070 = dma.done.wait [#allocation12], 1040  }
  0xa3   :  { %2071 = vsyncadd [#allocation12], 4294966256 }
  0xa4   :  { %2072 = dma.done.wait [#allocation15], 8448  }
  0xa5   :  { %2073 = vsyncadd [#allocation15], 4294958848  ;;  %v166_v0 = vld [vmem:[#allocation5 + $0x20] sm:$0xff]  ;;  %v167_v10 = vld [vmem:[#allocation5 + $0x28] sm:$0xff]  ;;  %vm2096_vm0 = vmmov 0  }
  0xa6   :  { %v174_v1 = vld [vmem:[#allocation5 + $0x60] sm:$0xff]  ;;  %v202_v3 = vunpack.c.l.s8.bf16 %v166_v0  ;;  %v203_v4 = vunpack.c.h.s8.bf16 %v166_v0  ;;  %v175_v11 = vld [vmem:[#allocation5 + $0x68] sm:$0xff]  ;;  %v204_v14 = vunpack.c.l.s8.bf16 %v167_v10  ;;  %v205_v24 = vunpack.c.h.s8.bf16 %v167_v10  ;;  %v168_v27 = vld [vmem:[#allocation5 + $0x30] sm:$0xff] }
  0xa7   :  { %v162_v2 = vld [vmem:[#allocation5] sm:$0xff]  ;;  %v218_v5 = vunpack.c.l.s8.bf16 %v174_v1  ;;  %v219_v6 = vunpack.c.h.s8.bf16 %v174_v1  ;;  %v220_v15 = vunpack.c.l.s8.bf16 %v175_v11  ;;  %v163_v16 = vld [vmem:[#allocation5 + $0x8] sm:$0xff]  ;;  %v221_v25 = vunpack.c.h.s8.bf16 %v175_v11  ;;  %v176_v28 = vld [vmem:[#allocation5 + $0x70] sm:$0xff] }
  0xa8   :  { %v170_v7 = vld [vmem:[#allocation5 + $0x40] sm:$0xff]  ;;  %v194_v8 = vunpack.c.l.s8.bf16 %v162_v2  ;;  %1646 = vmatprep.subr.bf16.mxu0 %v202_v3  ;;  %v195_v12 = vunpack.c.h.s8.bf16 %v162_v2  ;;  %v171_v17 = vld [vmem:[#allocation5 + $0x48] sm:$0xff]  ;;  %v196_v22 = vunpack.c.l.s8.bf16 %v163_v16  ;;  %v197_v30 = vunpack.c.h.s8.bf16 %v163_v16  ;;  %v164_v32 = vld [vmem:[#allocation5 + $0x10] sm:$0xff] }
  0xa9   :  { %v210_v9 = vunpack.c.l.s8.bf16 %v170_v7  ;;  %1668 = vmatprep.subr.bf16.mxu1 %v218_v5  ;;  %v211_v13 = vunpack.c.h.s8.bf16 %v170_v7  ;;  %v2305_v18 = vld [vmem:[#allocation2] sm:$0xff]  ;;  %v2309_v20 = vld [vmem:[#allocation2 + $0x8] sm:$0xff]  ;;  %v212_v23 = vunpack.c.l.s8.bf16 %v171_v17  ;;  %v213_v31 = vunpack.c.h.s8.bf16 %v171_v17  ;;  %v172_v35 = vld [vmem:[#allocation5 + $0x50] sm:$0xff] }
  0xaa   :  { %1647 = vmatpush3.bf16.msra.mxu0 %v194_v8  ;;  %v2307_v19 = vld [vmem:[#allocation2 + $0x20] sm:$0xff]  ;;  %v2311_v21 = vld [vmem:[#allocation2 + $0x28] sm:$0xff]  ;;  %v206_v33 = vunpack.c.l.s8.bf16 %v168_v27  ;;  %v222_v34 = vunpack.c.l.s8.bf16 %v176_v28  ;;  %v198_v36 = vunpack.c.l.s8.bf16 %v164_v32  ;;  %v214_v37 = vunpack.c.l.s8.bf16 %v172_v35  ;;  %v169_v38 = vld [vmem:[#allocation5 + $0x38] sm:$0xff] }
  0xab   :  { %1669 = vmatpush3.bf16.msra.mxu1 %v210_v9  ;;  %1648 = vmatprep.subr.bf16.mxu0 %v203_v4  ;;  %v1612_v26 = vcombine.high %v2305_v18, %v2307_v19  ;;  %v1614_v29 = vcombine.high %v2309_v20, %v2311_v21  ;;  %v177_v39 = vld [vmem:[#allocation5 + $0x78] sm:$0xff]  ;;  %v207_v40 = vunpack.c.h.s8.bf16 %v168_v27  ;;  %v223_v41 = vunpack.c.h.s8.bf16 %v176_v28  ;;  %v182_v52 = vld [vmem:[#allocation5 + $0xa0] sm:$0xff]  ;;  %v2317_v60 = vld [vmem:[#allocation2 + $0x10] sm:$0xff] }
  0xac   :  { %1670 = vmatprep.subr.bf16.mxu1 %v219_v6  ;;  %v165_v42 = vld [vmem:[#allocation5 + $0x18] sm:$0xff]  ;;  %v199_v44 = vunpack.c.h.s8.bf16 %v164_v32  ;;  %v215_v45 = vunpack.c.h.s8.bf16 %v172_v35  ;;  %v208_v46 = vunpack.c.l.s8.bf16 %v169_v38  ;;  %v224_v47 = vunpack.c.l.s8.bf16 %v177_v39  ;;  %v190_v53 = vld [vmem:[#allocation5 + $0xe0] sm:$0xff]  ;;  %v2323_v63 = vld [vmem:[#allocation2 + $0x30] sm:$0xff] }
  0xad   :  { %338 = vmatprep.mubr.bf16.mxu0 %v1612_v26  ;;  %379 = vmatprep.mubr.bf16.mxu1 %v1614_v29  ;;  %v173_v43 = vld [vmem:[#allocation5 + $0x58] sm:$0xff]  ;;  %v200_v48 = vunpack.c.l.s8.bf16 %v165_v42  ;;  %v209_v50 = vunpack.c.h.s8.bf16 %v169_v38  ;;  %v225_v51 = vunpack.c.h.s8.bf16 %v177_v39  ;;  %v201_v54 = vunpack.c.h.s8.bf16 %v165_v42  ;;  %v178_v58 = vld [vmem:[#allocation5 + $0x80] sm:$0xff]  ;;  %v183_v6 = vld [vmem:[#allocation5 + $0xa8] sm:$0xff] }
  0xae   :  { %1649 = vmatpush3.bf16.msra.mxu0 %v195_v12  ;;  %v216_v49 = vunpack.c.l.s8.bf16 %v173_v43  ;;  %v217_v55 = vunpack.c.h.s8.bf16 %v173_v43  ;;  %v234_v56 = vunpack.c.l.s8.bf16 %v182_v52  ;;  %v250_v57 = vunpack.c.l.s8.bf16 %v190_v53  ;;  %v186_v59 = vld [vmem:[#allocation5 + $0xc0] sm:$0xff]  ;;  %v2325_v0 = vld [vmem:[#allocation2 + $0x18] sm:$0xff]  ;;  %v191_v7 = vld [vmem:[#allocation5 + $0xe8] sm:$0xff] }
  0xaf   :  { %1671 = vmatpush3.bf16.msra.mxu1 %v211_v13  ;;  %1650 = vmatprep.subr.bf16.mxu0 %v204_v14  ;;  %v1611_v61 = vcombine.low %v2305_v18, %v2307_v19  ;;  %v1613_v62 = vcombine.low %v2309_v20, %v2311_v21  ;;  %v2327_v1 = vld [vmem:[#allocation2 + $0x38] sm:$0xff]  ;;  %v226_v2 = vunpack.c.l.s8.bf16 %v178_v58  ;;  %v242_v3 = vunpack.c.l.s8.bf16 %v186_v59  ;;  %v179_v14 = vld [vmem:[#allocation5 + $0x88] sm:$0xff]  ;;  %v184_v20 = vld [vmem:[#allocation5 + $0xb0] sm:$0xff] }
  0xb0   :  { %1672 = vmatprep.subr.bf16.mxu1 %v220_v15  ;;  %v235_v4 = vunpack.c.h.s8.bf16 %v182_v52  ;;  %v251_v5 = vunpack.c.h.s8.bf16 %v190_v53  ;;  %v1616_v8 = vcombine.high %v2317_v60, %v2323_v63  ;;  %v1618_v9 = vcombine.high %v2325_v0, %v2327_v1  ;;  %v187_v15 = vld [vmem:[#allocation5 + $0xc8] sm:$0xff]  ;;  %v192_v21 = vld [vmem:[#allocation5 + $0xf0] sm:$0xff]  ;;  %v185_v32 = vld [vmem:[#allocation5 + $0xb8] sm:$0xff] }
  0xb1   :  { %v227_v10 = vunpack.c.h.s8.bf16 %v178_v58  ;;  %v243_v11 = vunpack.c.h.s8.bf16 %v186_v59  ;;  %v236_v12 = vunpack.c.l.s8.bf16 %v183_v6  ;;  %v252_v13 = vunpack.c.l.s8.bf16 %v191_v7  ;;  %v180_v26 = vld [vmem:[#allocation5 + $0x90] sm:$0xff]  ;;  %v181_v38 = vld [vmem:[#allocation5 + $0x98] sm:$0xff]  ;;  %v1792_v53 = vld [vmem:[#allocation10 + $0x20] ss:$8 sps:$4 sm:$0xff]  }
  0xb2   :  { %1651 = vmatpush3.bf16.msra.mxu0 %v196_v22  ;;  %v228_v16 = vunpack.c.l.s8.bf16 %v179_v14  ;;  %v244_v17 = vunpack.c.l.s8.bf16 %v187_v15  ;;  %v237_v18 = vunpack.c.h.s8.bf16 %v183_v6  ;;  %v253_v19 = vunpack.c.h.s8.bf16 %v191_v7  ;;  %v188_v27 = vld [vmem:[#allocation5 + $0xd0] sm:$0xff]  ;;  %v189_v39 = vld [vmem:[#allocation5 + $0xd8] sm:$0xff] }
  0xb3   :  { %1673 = vmatpush3.bf16.msra.mxu1 %v212_v23  ;;  %1652 = vmatprep.subr.bf16.mxu0 %v205_v24  ;;  %v229_v22 = vunpack.c.h.s8.bf16 %v179_v14  ;;  %v245_v23 = vunpack.c.h.s8.bf16 %v187_v15  ;;  %v238_v24 = vunpack.c.l.s8.bf16 %v184_v20  ;;  %v230_v28 = vunpack.c.l.s8.bf16 %v180_v26  ;;  %v1794_v52 = vld [vmem:[#allocation10 + $0x24] ss:$8 sps:$4 sm:$0xff]   ;;  %v1803_v58 = vld [vmem:[#allocation10 + $0x54] ss:$8 sps:$4 sm:$0xff]   ;;  %v1801_v59 = vld [vmem:[#allocation10 + $0x50] ss:$8 sps:$4 sm:$0xff]  }
  0xb4   :  { %1674 = vmatprep.subr.bf16.mxu1 %v221_v25  ;;  %v254_v25 = vunpack.c.l.s8.bf16 %v192_v21  ;;  %v246_v29 = vunpack.c.l.s8.bf16 %v188_v27  ;;  %v247_v35 = vunpack.c.h.s8.bf16 %v188_v27  ;;  %v241_v42 = vunpack.c.h.s8.bf16 %v185_v32 }
  0xb6   :  { %1653 = vmatpush3.bf16.msra.mxu0 %v197_v30  ;;  %v239_v30 = vunpack.c.h.s8.bf16 %v184_v20 }
  0xb7   :  { %1675 = vmatpush3.bf16.msra.mxu1 %v213_v31  ;;  %1654 = vmatprep.subr.bf16.mxu0 %v206_v33  ;;  %v255_v31 = vunpack.c.h.s8.bf16 %v192_v21  ;;  %v193_v33 = vld [vmem:[#allocation5 + $0xf8] sm:$0xff] }
  0xb8   :  { %1676 = vmatprep.subr.bf16.mxu1 %v222_v34  ;;  %v231_v34 = vunpack.c.h.s8.bf16 %v180_v26  ;;  %v257_v43 = vunpack.c.h.s8.bf16 %v193_v33 }
  0xba   :  { %1655 = vmatpush3.bf16.msra.mxu0 %v198_v36  ;;  %v240_v36 = vunpack.c.l.s8.bf16 %v185_v32 }
  0xbb   :  { %1677 = vmatpush3.bf16.msra.mxu1 %v214_v37  ;;  %1656 = vmatprep.subr.bf16.mxu0 %v207_v40  ;;  %v256_v37 = vunpack.c.l.s8.bf16 %v193_v33  ;;  %v232_v40 = vunpack.c.l.s8.bf16 %v181_v38  ;;  %v1620_v33 = vld [vmem:[#allocation8] ss:$0 sm:$0xff] }
  0xbc   :  { %1678 = vmatprep.subr.bf16.mxu1 %v223_v41  ;;  %v248_v41 = vunpack.c.l.s8.bf16 %v189_v39 }
  0xbe   :  { %1657 = vmatpush3.bf16.msra.mxu0 %v199_v44  ;;  %v233_v44 = vunpack.c.h.s8.bf16 %v181_v38 }
  0xbf   :  { %1679 = vmatpush3.bf16.msra.mxu1 %v215_v45  ;;  %1658 = vmatprep.subr.bf16.mxu0 %v208_v46  ;;  %v249_v45 = vunpack.c.h.s8.bf16 %v189_v39  ;;  %v1615_v46 = vcombine.low %v2317_v60, %v2323_v63  ;;  %v1806_v60 = vld [vmem:[#allocation10 + $0x64] ss:$8 sps:$4 sm:$0xff]   ;;  %v1807_v63 = vld [vmem:[#allocation10 + $0x70] ss:$8 sps:$4 sm:$0xff]  }
  0xc0   :  { %1680 = vmatprep.subr.bf16.mxu1 %v224_v47  ;;  %v1617_v47 = vcombine.low %v2325_v0, %v2327_v1  ;;  %v2094_v0 = vmov 0   ;;  %v1810_v1 = vld [vmem:[#allocation11] sm:$0xff]  }
  0xc2   :  { %1659 = vmatpush3.bf16.msra.mxu0 %v200_v48  ;;  %v1786_v48 = vld [vmem:[#allocation10] ss:$8 sps:$4 sm:$0xff]  }
  0xc3   :  { %1681 = vmatpush3.bf16.msra.mxu1 %v216_v49  ;;  %1660 = vmatprep.subr.bf16.mxu0 %v209_v50  ;;  %v1788_v49 = vld [vmem:[#allocation10 + $0x4] ss:$8 sps:$4 sm:$0xff]   ;;  %v1791_v50 = vld [vmem:[#allocation10 + $0x14] ss:$8 sps:$4 sm:$0xff]  }
  0xc4   :  { %1682 = vmatprep.subr.bf16.mxu1 %v225_v51  ;;  %v1789_v51 = vld [vmem:[#allocation10 + $0x10] ss:$8 sps:$4 sm:$0xff]  }
  0xc6   :  { %1661 = vmatpush3.bf16.msra.mxu0 %v201_v54  ;;  %v1797_v54 = vld [vmem:[#allocation10 + $0x34] ss:$8 sps:$4 sm:$0xff]  }
  0xc7   :  { %1683 = vmatpush3.bf16.msra.mxu1 %v217_v55  ;;  %1690 = vmatprep.subr.bf16.mxu0 %v234_v56  ;;  %v1795_v55 = vld [vmem:[#allocation10 + $0x30] ss:$8 sps:$4 sm:$0xff]   ;;  %v1800_v56 = vld [vmem:[#allocation10 + $0x44] ss:$8 sps:$4 sm:$0xff]  }
  0xc8   :  { %1712 = vmatprep.subr.bf16.mxu1 %v250_v57  ;;  %v1798_v57 = vld [vmem:[#allocation10 + $0x40] ss:$8 sps:$4 sm:$0xff]  }
  0xc9   :  { %339 = vmatmul.mubr.bf16.vlgmr.msra.gmra.mrb[0].mxu0 %v1611_v61  ;;  %v1804_v61 = vld [vmem:[#allocation10 + $0x60] ss:$8 sps:$4 sm:$0xff]  }
  0xca   :  { %380 = vmatmul.mubr.bf16.vlgmr.msra.gmra.mrb[0].mxu1 %v1613_v62  ;;  %1691 = vmatpush3.bf16.msra.mxu0 %v226_v2  ;;  %v1809_v62 = vld [vmem:[#allocation10 + $0x74] ss:$8 sps:$4 sm:$0xff]   ;;  %v2095_v2 = vmov 0.0  }
  0xcb   :  { %1713 = vmatpush3.bf16.msra.mxu1 %v242_v3  ;;  %1692 = vmatprep.subr.bf16.mxu0 %v235_v4 }
  0xcc   :  { %1714 = vmatprep.subr.bf16.mxu1 %v251_v5  ;;  %420 = vmatprep.mubr.bf16.mxu0 %v1616_v8 }
  0xcd   :  { %461 = vmatprep.mubr.bf16.mxu1 %v1618_v9 }
  0xce   :  { %1693 = vmatpush3.bf16.msra.mxu0 %v227_v10 }
  0xcf   :  { %1715 = vmatpush3.bf16.msra.mxu1 %v243_v11  ;;  %1694 = vmatprep.subr.bf16.mxu0 %v236_v12 }
  0xd0   :  { %1716 = vmatprep.subr.bf16.mxu1 %v252_v13 }
  0xd2   :  { %1695 = vmatpush3.bf16.msra.mxu0 %v228_v16 }
  0xd3   :  { %1717 = vmatpush3.bf16.msra.mxu1 %v244_v17  ;;  %1696 = vmatprep.subr.bf16.mxu0 %v237_v18 }
  0xd4   :  { %1718 = vmatprep.subr.bf16.mxu1 %v253_v19 }
  0xd6   :  { %1697 = vmatpush3.bf16.msra.mxu0 %v229_v22 }
  0xd7   :  { %1719 = vmatpush3.bf16.msra.mxu1 %v245_v23  ;;  %1698 = vmatprep.subr.bf16.mxu0 %v238_v24 }
  0xd8   :  { %1720 = vmatprep.subr.bf16.mxu1 %v254_v25 }
  0xda   :  { %1699 = vmatpush3.bf16.msra.mxu0 %v230_v28 }
  0xdb   :  { %1721 = vmatpush3.bf16.msra.mxu1 %v246_v29  ;;  %1700 = vmatprep.subr.bf16.mxu0 %v239_v30  ;;  %v1619_v30 = vld [vmem:[#allocation7] ss:$0 sm:$0xff] }
  0xdc   :  { %1722 = vmatprep.subr.bf16.mxu1 %v255_v31 }
  0xde   :  { %1701 = vmatpush3.bf16.msra.mxu0 %v231_v34 }
  0xdf   :  { %1723 = vmatpush3.bf16.msra.mxu1 %v247_v35  ;;  %1702 = vmatprep.subr.bf16.mxu0 %v240_v36 }
  0xe0   :  { %1724 = vmatprep.subr.bf16.mxu1 %v256_v37 }
  0xe2   :  { %1703 = vmatpush3.bf16.msra.mxu0 %v232_v40 }
  0xe3   :  { %1725 = vmatpush3.bf16.msra.mxu1 %v248_v41  ;;  %1704 = vmatprep.subr.bf16.mxu0 %v241_v42  ;;  %v1811_v42 = vld [vmem:[#allocation11 + $0x8] sm:$0xff]  }
  0xe4   :  { %1726 = vmatprep.subr.bf16.mxu1 %v257_v43  ;;  %v1812_v43 = vld [vmem:[#allocation11 + $0x10] sm:$0xff]  }
  0xe6   :  { %1705 = vmatpush3.bf16.msra.mxu0 %v233_v44  ;;  %v1813_v44 = vld [vmem:[#allocation11 + $0x18] sm:$0xff]  }
  0xe7   :  { %1727 = vmatpush3.bf16.msra.mxu1 %v249_v45  ;;  %599 = vmatprep.subr.bf16.mxu0 %v1788_v49  ;;  %v1814_v45 = vld [vmem:[#allocation11 + $0x20] sm:$0xff]   ;;  %v770_v49 = vld [vmem:[#allocation14 + $0x8] sm:$0xff] }
  0xe8   :  { %1743 = vmatprep.subr.bf16.mxu1 %v2095_v2 }
  0xe9   :  { %421 = vmatmul.mubr.bf16.vlgmr.msra.gmra.mrb[4].mxu0 %v1615_v46  ;;  %v1815_v46 = vld [vmem:[#allocation11 + $0x28] sm:$0xff]  }
  0xea   :  { %462 = vmatmul.mubr.bf16.vlgmr.msra.gmra.mrb[4].mxu1 %v1617_v47  ;;  %600 = vmatpush1.bf16.msra.mxu0 %v1786_v48  ;;  %v1816_v47 = vld [vmem:[#allocation11 + $0x30] sm:$0xff]   ;;  %v1817_v48 = vld [vmem:[#allocation11 + $0x38] sm:$0xff]  }
  0xeb   :  { %601 = vmatprep.subr.bf16.mxu0 %v1791_v50  ;;  %631 = vmatprep.mubr.bf16.mxu0 %v2094_v0  ;;  %v2348_v50 = vld [vmem:[#allocation14 + $0x18] sm:$0xff] }
  0xec   :  { %1744 = vmatpush3.bf16.msra.mxu1 %v1810_v1  ;;  %1759 = vmatprep.mubr.msk.bf16.mxu1 %vm2096_vm0, %v2095_v2 }
  0xed   :  { %1745 = vmatprep.subr.bf16.mxu1 %v2095_v2 }
  0xee   :  { %602 = vmatpush1.bf16.msra.mxu0 %v1789_v51  ;;  %v769_v51 = vld [vmem:[#allocation14] sm:$0xff] }
  0xef   :  { %603 = vmatprep.subr.bf16.mxu0 %v1794_v52  ;;  %v834_v52 = vunpack.c.l.s8.bf16 %v770_v49 }
  0xf0   :  { %1746 = vmatpush3.bf16.msra.mxu1 %v1811_v42 }
  0xf1   :  { %1747 = vmatprep.subr.bf16.mxu1 %v2095_v2 }
  0xf2   :  { %604 = vmatpush1.bf16.msra.mxu0 %v1792_v53  ;;  %v836_v53 = vunpack.c.l.s8.bf16 %v2348_v50 }
  0xf3   :  { %605 = vmatprep.subr.bf16.mxu0 %v1797_v54  ;;  %v833_v54 = vunpack.c.l.s8.bf16 %v769_v51 }
  0xf4   :  { %1748 = vmatpush3.bf16.msra.mxu1 %v1812_v43  ;;  %v804_v43 = vld [vmem:[#allocation14 + $0x118] sm:$0xff] }
  0xf5   :  { %1749 = vmatprep.subr.bf16.mxu1 %v2095_v2 }
  0xf6   :  { %606 = vmatpush1.bf16.msra.mxu0 %v1795_v55  ;;  %v850_v55 = vunpack.c.h.s8.bf16 %v770_v49 }
  0xf7   :  { %607 = vmatprep.subr.bf16.mxu0 %v1800_v56  ;;  %v849_v56 = vunpack.c.h.s8.bf16 %v769_v51  ;;  %v820_v51 = vld [vmem:[#allocation14 + $0x198] sm:$0xff] }
  0xf8   :  { %1750 = vmatpush3.bf16.msra.mxu1 %v1813_v44 }
  0xf9   :  { %1751 = vmatprep.subr.bf16.mxu1 %v2095_v2 }
  0xfa   :  { %608 = vmatpush1.bf16.msra.mxu0 %v1798_v57  ;;  %v786_v57 = vld [vmem:[#allocation14 + $0x88] sm:$0xff] }
  0xfb   :  { %609 = vmatprep.subr.bf16.mxu0 %v1803_v58  ;;  %v866_v58 = vunpack.c.l.s8.bf16 %v786_v57 }
  0xfc   :  { %1752 = vmatpush3.bf16.msra.mxu1 %v1814_v45  ;;  %v900_v45 = vunpack.c.l.s8.bf16 %v804_v43 }
  0xfd   :  { %1753 = vmatprep.subr.bf16.mxu1 %v2095_v2 }
  0xfe   :  { %610 = vmatpush1.bf16.msra.mxu0 %v1801_v59  ;;  %v785_v59 = vld [vmem:[#allocation14 + $0x80] sm:$0xff] }
  0xff   :  { %611 = vmatprep.subr.bf16.mxu0 %v1806_v60  ;;  %v865_v60 = vunpack.c.l.s8.bf16 %v785_v59 }
 0x100   :  { %1754 = vmatpush3.bf16.msra.mxu1 %v1815_v46  ;;  %v803_v46 = vld [vmem:[#allocation14 + $0x110] sm:$0xff] }
 0x101   :  { %1755 = vmatprep.subr.bf16.mxu1 %v2095_v2  ;;  %v915_v49 = vunpack.c.h.s8.bf16 %v803_v46 }
 0x102   :  { %612 = vmatpush1.bf16.msra.mxu0 %v1804_v61  ;;  %v882_v61 = vunpack.c.h.s8.bf16 %v786_v57 }
 0x103   :  { %613 = vmatprep.subr.bf16.mxu0 %v1809_v62  ;;  %v881_v62 = vunpack.c.h.s8.bf16 %v785_v59  ;;  %v948_v59 = vunpack.c.h.s8.bf16 %v820_v51 }
 0x104   :  { %1756 = vmatpush3.bf16.msra.mxu1 %v1816_v47  ;;  %v899_v47 = vunpack.c.l.s8.bf16 %v803_v46  ;;  %v822_v46 = vld [vmem:[#allocation14 + $0x1a8] sm:$0xff] }
 0x105   :  { %1757 = vmatprep.subr.bf16.mxu1 %v2095_v2  ;;  %v801_v2 = vld [vmem:[#allocation14 + $0x100] sm:$0xff] }
 0x106   :  { %614 = vmatpush1.bf16.msra.mxu0 %v1807_v63  ;;  %v802_v63 = vld [vmem:[#allocation14 + $0x108] sm:$0xff] }
 0x107   :  { %962 = vmatprep.subr.bf16.mxu0 %v834_v52  ;;  %v898_v1 = vunpack.c.l.s8.bf16 %v802_v63 }
 0x108   :  { %1758 = vmatpush3.bf16.msra.mxu1 %v1817_v48  ;;  %v916_v48 = vunpack.c.h.s8.bf16 %v804_v43 }
 0x109   :  { %1005 = vmatprep.subr.bf16.mxu1 %v836_v53  ;;  %v932_v53 = vunpack.c.l.s8.bf16 %v820_v51 }
 0x19c   :  { %v1662_v3 = vpop.f32.mrb[0].mxu0 }
 0x19d   :  { %v1684_v4 = vpop.f32.mrb[0].mxu1  ;;  %v1663_v5 = vpop.f32.mrb[1].mxu0 }
 0x19e   :  { %v1685_v6 = vpop.f32.mrb[1].mxu1  ;;  %v1664_v7 = vadd.f32 %v1663_v5, %v1662_v3  ;;  %v1665_v9 = vpop.f32.mrb[2].mxu0  ;;  %v897_v3 = vunpack.c.l.s8.bf16 %v801_v2  ;;  %v913_v5 = vunpack.c.h.s8.bf16 %v801_v2 }
 0x19f   :  { %v1686_v8 = vadd.f32 %v1685_v6, %v1684_v4  ;;  %v1687_v10 = vpop.f32.mrb[2].mxu1  ;;  %v1666_v11 = vpop.f32.mrb[3].mxu0  ;;  %v914_v4 = vunpack.c.h.s8.bf16 %v802_v63  ;;  %v509_v6 = vlaneseq  ;;  %v776_v63 = vld [vmem:[#allocation14 + $0x38] sm:$0xff] }
 0x1a0   :  { %v1688_v12 = vpop.f32.mrb[3].mxu1  ;;  %v1667_v14 = vadd.f32 %v1666_v11, %v1665_v9  ;;  %v507_v9 = vld [vmem:[%s2476_s5] sm:$0x3]  ;;  %v840_v2 = vunpack.c.l.s8.bf16 %v776_v63  ;;  %s2097_s5 = smov [#allocation18]  }
 0x1a1   :  { %v382_v13 = vadd.f32 %v1686_v8, %v1664_v7  ;;  %v1689_v15 = vadd.f32 %v1688_v12, %v1687_v10  ;;  %v2351_v7 = vshrl.u32 %v509_v6, 7  ;;  %s1591_s17 = sshll.u32 %s2097_s5, 4  ;;  %s1592_s17 = int_to_ptr.vmem [resolvable:$true] %s1591_s17 }
 0x1a2   :  { %s2020_s20 = scalar_lea.vmem %s1592_s17, 512  ;;  %p2025_p3 = scmp.lt.s32.totalorder %s1592_s17, %s1592_s17 }
 0x1a3   :  { %v385_v16 = vadd.f32 %v1689_v15, %v1667_v14  ;;  %v2354_v8 = vsub.s32 0, %v2351_v7  ;;  %v2360_v10 = vsub.s32 1, %v2351_v7  ;;  %p2021_p2 = scmp.ne.s32.totalorder %s1592_s17, %s2020_s20  ;;  %p2026_p4 = scmp.lt.s32.totalorder %s2020_s20, %s2020_s20 }
 0x1a5   :  { %v512_v11 = vrot.slane %v507_v9, %v2354_v8  ;;  %v516_v12 = vrot.slane %v507_v9, %v2360_v10  ;;  %p2027_p5 = por %p2026_p4, %p2025_p3 }
 0x1a7   :  { %p2028_p6 = pnand %p2027_p5, %p2021_p2 }
 0x1bc   :  { %v1706_v17 = vpop.f32.mrb[4].mxu0 }
 0x1bd   :  { %v1728_v18 = vpop.f32.mrb[4].mxu1  ;;  %v1707_v19 = vpop.f32.mrb[5].mxu0 }
 0x1be   :  { %v1729_v20 = vpop.f32.mrb[5].mxu1  ;;  %v1708_v21 = vadd.f32 %v1707_v19, %v1706_v17  ;;  %v1709_v23 = vpop.f32.mrb[6].mxu0 }
 0x1bf   :  { %v1730_v22 = vadd.f32 %v1729_v20, %v1728_v18  ;;  %v1731_v24 = vpop.f32.mrb[6].mxu1  ;;  %v1710_v25 = vpop.f32.mrb[7].mxu0 }
 0x1c0   :  { %v1732_v26 = vpop.f32.mrb[7].mxu1  ;;  %v423_v27 = vadd.f32 %v1708_v21, %v382_v13  ;;  %v1711_v28 = vadd.f32 %v1710_v25, %v1709_v23  ;;  %v648_v25 = vld [vmem:[#allocation16] sm:$0xff] }
 0x1c1   :  { %v1733_v29 = vadd.f32 %v1732_v26, %v1731_v24 }
 0x1c2   :  { %v464_v31 = vadd.f32 %v1730_v22, %v423_v27  ;;  %v426_v32 = vadd.f32 %v1711_v28, %v385_v16  ;;  %v649_v27 = vld [vmem:[#allocation16 + $0x8] sm:$0xff] }
 0x1c4   :  { %v477_v34 = vmul.f32 %v1619_v30, %v464_v31  ;;  %v467_v35 = vadd.f32 %v1733_v29, %v426_v32  ;;  %v771_v32 = vld [vmem:[#allocation14 + $0x10] sm:$0xff] }
 0x1c6   :  { %v486_v36 = vadd.f32 %v1620_v33, %v477_v34  ;;  %v478_v37 = vmul.f32 %v1619_v30, %v467_v35  ;;  %v835_v34 = vunpack.c.l.s8.bf16 %v771_v32 }
 0x1c8   :  { %v487_v38 = vadd.f32 %v1620_v33, %v478_v37  ;;  %v488_v39 = vmax.f32 %v486_v36, 0.0  ;;  %v852_v36 = vunpack.c.h.s8.bf16 %v2348_v50  ;;  %v788_v37 = vld [vmem:[#allocation14 + $0x98] sm:$0xff]  ;;  %v818_v50 = vld [vmem:[#allocation14 + $0x188] sm:$0xff] }
 0x1c9   :  { %v884_v42 = vunpack.c.h.s8.bf16 %v788_v37  ;;  %v930_v52 = vunpack.c.l.s8.bf16 %v818_v50 }
 0x1ca   :  { %v489_v40 = vmax.f32 %v487_v38, 0.0  ;;  %v851_v38 = vunpack.c.h.s8.bf16 %v771_v32 }
 0x1cc   :  { %v490_v41 = vpack.c.bf16 %v489_v40, %v488_v39  ;;  %v868_v39 = vunpack.c.l.s8.bf16 %v788_v37  ;;  %v787_v40 = vld [vmem:[#allocation14 + $0x90] sm:$0xff] }
 0x1cd   :  { %v883_v44 = vunpack.c.h.s8.bf16 %v787_v40 }
 0x1ce   :  { %632 = vmatmul.mubr.bf16.vlgmr.msra.gmra.mrb[8].mxu0 %v490_v41  ;;  %v867_v41 = vunpack.c.l.s8.bf16 %v787_v40  ;;  %v805_v40 = vld [vmem:[#allocation14 + $0x120] sm:$0xff] }
 0x1cf   :  { %994 = vmatprep.mubr.bf16.mxu0 %v2094_v0  ;;  %963 = vmatpush1.bf16.msra.mxu0 %v833_v54  ;;  %v817_v54 = vld [vmem:[#allocation14 + $0x180] sm:$0xff] }
 0x1d0   :  { %964 = vmatprep.subr.bf16.mxu0 %v850_v55  ;;  %v819_v55 = vld [vmem:[#allocation14 + $0x190] sm:$0xff] }
 0x1d1   :  { %v931_v57 = vunpack.c.l.s8.bf16 %v819_v55 }
 0x1d3   :  { %965 = vmatpush1.bf16.msra.mxu0 %v849_v56  ;;  %v929_v56 = vunpack.c.l.s8.bf16 %v817_v54 }
 0x1d4   :  { %966 = vmatprep.subr.bf16.mxu0 %v866_v58  ;;  %v946_v58 = vunpack.c.h.s8.bf16 %v818_v50  ;;  %v934_v50 = vunpack.c.l.s8.bf16 %v822_v46 }
 0x1d7   :  { %967 = vmatpush1.bf16.msra.mxu0 %v865_v60  ;;  %v945_v60 = vunpack.c.h.s8.bf16 %v817_v54 }
 0x1d8   :  { %968 = vmatprep.subr.bf16.mxu0 %v882_v61  ;;  %v947_v61 = vunpack.c.h.s8.bf16 %v819_v55 }
 0x1db   :  { %969 = vmatpush1.bf16.msra.mxu0 %v881_v62  ;;  %v774_v62 = vld [vmem:[#allocation14 + $0x28] sm:$0xff] }
 0x1dc   :  { %970 = vmatprep.subr.bf16.mxu0 %v898_v1  ;;  %v838_v1 = vunpack.c.l.s8.bf16 %v774_v62 }
 0x1df   :  { %971 = vmatpush1.bf16.msra.mxu0 %v897_v3  ;;  %v1637_v3 = vld [vmem:[#allocation13] ss:$0 sm:$0xff] }
 0x1e0   :  { %972 = vmatprep.subr.bf16.mxu0 %v914_v4 }
 0x1e3   :  { %973 = vmatpush1.bf16.msra.mxu0 %v913_v5 }
 0x1e4   :  { %974 = vmatprep.subr.bf16.mxu0 %v930_v52  ;;  %v821_v52 = vld [vmem:[#allocation14 + $0x1a0] sm:$0xff] }
 0x1e5   :  { %v933_v54 = vunpack.c.l.s8.bf16 %v821_v52 }
 0x1e7   :  { %975 = vmatpush1.bf16.msra.mxu0 %v929_v56  ;;  %v950_v56 = vunpack.c.h.s8.bf16 %v822_v46 }
 0x1e8   :  { %976 = vmatprep.subr.bf16.mxu0 %v946_v58  ;;  %v778_v58 = vld [vmem:[#allocation14 + $0x48] sm:$0xff] }
 0x1eb   :  { %977 = vmatpush1.bf16.msra.mxu0 %v945_v60  ;;  %v949_v60 = vunpack.c.h.s8.bf16 %v821_v52 }
 0x1ec   :  { %1048 = vmatprep.subr.bf16.mxu0 %v838_v1  ;;  %v777_v1 = vld [vmem:[#allocation14 + $0x40] sm:$0xff] }
 0x2a1   :  { %v633_v13 = vpop.f32.mrb[8].mxu0 }
 0x2a2   :  { %v634_v14 = vadd.f32 %v633_v13, %v512_v11  ;;  %v635_v15 = vpop.f32.mrb[9].mxu0  ;;  %v773_v13 = vld [vmem:[#allocation14 + $0x20] sm:$0xff] }
 0x2a3   :  { %v636_v16 = vadd.f32 %v635_v15, %v516_v12  ;;  %v637_v17 = vpop.f32.mrb[10].mxu0 }
 0x2a4   :  { %1570 = vst [vmem:[#allocation18] sm:$0xff] %v634_v14  ;;  %v638_v18 = vadd.f32 %v637_v17, %v512_v11  ;;  %v639_v19 = vpop.f32.mrb[11].mxu0  ;;  %v837_v17 = vunpack.c.l.s8.bf16 %v773_v13 }
 0x2a5   :  { %v642_v20 = vmul.f32 0.5, %v636_v16  ;;  %1571 = vst [vmem:[#allocation18 + $0x8] sm:$0xff] %v636_v16  ;;  %v640_v21 = vadd.f32 %v639_v19, %v516_v12 }
 0x2a6   :  { %1572 = vst [vmem:[#allocation18 + $0x10] sm:$0xff] %v638_v18 }
 0x2a7   :  { %v644_v22 = vmul.f32 1.442695, %v642_v20  ;;  %v643_v23 = vmul.f32 0.5, %v640_v21  ;;  %1573 = vst [vmem:[#allocation18 + $0x18] sm:$0xff] %v640_v21  ;;  %v854_v20 = vunpack.c.h.s8.bf16 %v774_v62  ;;  %v856_v21 = vunpack.c.h.s8.bf16 %v776_v63 }
 0x2a8   :  { %v842_v62 = vunpack.c.l.s8.bf16 %v778_v58 }
 0x2a9   :  { %1818 = vpow2.f32 %v644_v22  ;;  %v646_v24 = vmul.f32 1.442695, %v643_v23  ;;  %v790_v22 = vld [vmem:[#allocation14 + $0xa8] sm:$0xff]  ;;  %v792_v23 = vld [vmem:[#allocation14 + $0xb8] sm:$0xff] }
 0x2aa   :  { %v886_v32 = vunpack.c.h.s8.bf16 %v790_v22 }
 0x2ab   :  { %1820 = vpow2.f32 %v646_v24  ;;  %v853_v24 = vunpack.c.h.s8.bf16 %v773_v13 }
 0x2b3   :  { %v1819_v26 = vpop.eup %1818 }
 0x2b4   :  { %v650_v28 = vmul.f32 %v1819_v26, %v648_v25  ;;  %v870_v26 = vunpack.c.l.s8.bf16 %v790_v22 }
 0x2b5   :  { %v1821_v29 = vpop.eup %1820 }
 0x2b6   :  { %v651_v30 = vmul.f32 %v1821_v29, %v649_v27  ;;  %v652_v31 = vadd.f32 %v650_v28, %v634_v14  ;;  %v775_v14 = vld [vmem:[#allocation14 + $0x30] sm:$0xff]  ;;  %v872_v27 = vunpack.c.l.s8.bf16 %v792_v23  ;;  %v789_v28 = vld [vmem:[#allocation14 + $0xa0] sm:$0xff] }
 0x2b7   :  { %v855_v25 = vunpack.c.h.s8.bf16 %v775_v14  ;;  %v791_v29 = vld [vmem:[#allocation14 + $0xb0] sm:$0xff] }
 0x2b8   :  { %v653_v33 = vadd.f32 %v651_v30, %v638_v18  ;;  %v839_v18 = vunpack.c.l.s8.bf16 %v775_v14  ;;  %v869_v30 = vunpack.c.l.s8.bf16 %v789_v28  ;;  %v887_v37 = vunpack.c.h.s8.bf16 %v791_v29 }
 0x2ba   :  { %v654_v35 = vpack.c.bf16 %v653_v33, %v652_v31  ;;  %v871_v31 = vunpack.c.l.s8.bf16 %v791_v29  ;;  %v888_v33 = vunpack.c.h.s8.bf16 %v792_v23  ;;  %v810_v23 = vld [vmem:[#allocation14 + $0x148] sm:$0xff]  ;;  %v809_v29 = vld [vmem:[#allocation14 + $0x140] sm:$0xff] }
 0x2bc   :  { %1760 = vmatmul.mubr.bf16.vlgmr.msra.gmra.mrb[8].mxu1 %v654_v35  ;;  %v808_v35 = vld [vmem:[#allocation14 + $0x138] sm:$0xff] }
 0x2bd   :  { %1006 = vmatpush1.bf16.msra.mxu1 %v835_v34  ;;  %1037 = vmatprep.mubr.bf16.mxu1 %v2094_v0  ;;  %v806_v34 = vld [vmem:[#allocation14 + $0x128] sm:$0xff] }
 0x2be   :  { %1007 = vmatprep.subr.bf16.mxu1 %v852_v36  ;;  %v885_v36 = vunpack.c.h.s8.bf16 %v789_v28 }
 0x2c1   :  { %1008 = vmatpush1.bf16.msra.mxu1 %v851_v38  ;;  %v902_v38 = vunpack.c.l.s8.bf16 %v806_v34 }
 0x2c2   :  { %1009 = vmatprep.subr.bf16.mxu1 %v868_v39  ;;  %v904_v39 = vunpack.c.l.s8.bf16 %v808_v35 }
 0x2c5   :  { %1010 = vmatpush1.bf16.msra.mxu1 %v867_v41  ;;  %v807_v41 = vld [vmem:[#allocation14 + $0x130] sm:$0xff] }
 0x2c6   :  { %1011 = vmatprep.subr.bf16.mxu1 %v884_v42  ;;  %v901_v42 = vunpack.c.l.s8.bf16 %v805_v40  ;;  %v903_v43 = vunpack.c.l.s8.bf16 %v807_v41 }
 0x2c9   :  { %1012 = vmatpush1.bf16.msra.mxu1 %v883_v44  ;;  %v918_v44 = vunpack.c.h.s8.bf16 %v806_v34 }
 0x2ca   :  { %1013 = vmatprep.subr.bf16.mxu1 %v900_v45  ;;  %v920_v45 = vunpack.c.h.s8.bf16 %v808_v35  ;;  %v826_v35 = vld [vmem:[#allocation14 + $0x1c8] sm:$0xff] }
 0x2cd   :  { %1014 = vmatpush1.bf16.msra.mxu1 %v899_v47  ;;  %v824_v47 = vld [vmem:[#allocation14 + $0x1b8] sm:$0xff] }
 0x2ce   :  { %1015 = vmatprep.subr.bf16.mxu1 %v916_v48  ;;  %v917_v48 = vunpack.c.h.s8.bf16 %v805_v40  ;;  %v936_v51 = vunpack.c.l.s8.bf16 %v824_v47 }
 0x2d1   :  { %1016 = vmatpush1.bf16.msra.mxu1 %v915_v49  ;;  %v919_v49 = vunpack.c.h.s8.bf16 %v807_v41  ;;  %v825_v41 = vld [vmem:[#allocation14 + $0x1c0] sm:$0xff] }
 0x2d2   :  { %1017 = vmatprep.subr.bf16.mxu1 %v932_v53  ;;  %v823_v53 = vld [vmem:[#allocation14 + $0x1b0] sm:$0xff] }
 0x2d3   :  { %v935_v55 = vunpack.c.l.s8.bf16 %v823_v53 }
 0x2d5   :  { %1018 = vmatpush1.bf16.msra.mxu1 %v931_v57  ;;  %v952_v57 = vunpack.c.h.s8.bf16 %v824_v47  ;;  %v782_v47 = vld [vmem:[#allocation14 + $0x68] sm:$0xff] }
 0x2d6   :  { %1019 = vmatprep.subr.bf16.mxu1 %v948_v59  ;;  %v780_v59 = vld [vmem:[#allocation14 + $0x58] sm:$0xff] }
 0x2d7   :  { %v844_v63 = vunpack.c.l.s8.bf16 %v780_v59 }
 0x2d9   :  { %1020 = vmatpush1.bf16.msra.mxu1 %v947_v61  ;;  %v951_v61 = vunpack.c.h.s8.bf16 %v823_v53  ;;  %v781_v53 = vld [vmem:[#allocation14 + $0x60] sm:$0xff] }
 0x2da   :  { %1091 = vmatprep.subr.bf16.mxu1 %v840_v2  ;;  %v779_v2 = vld [vmem:[#allocation14 + $0x50] sm:$0xff] }
 0x2db   :  { %v859_v13 = vunpack.c.h.s8.bf16 %v779_v2 }
 0x38f   :  { %v760_v4 = vpop.f32.mrb[8].mxu1 }
 0x390   :  { %v761_v5 = vadd.f32 %v1637_v3, %v760_v4  ;;  %v1761_v6 = vpop.f32.mrb[9].mxu1  ;;  %v843_v4 = vunpack.c.l.s8.bf16 %v779_v2  ;;  %v797_v2 = vld [vmem:[#allocation14 + $0xe0] sm:$0xff] }
 0x391   :  { %v763_v9 = vpop.f32.mrb[10].mxu1  ;;  %v860_v6 = vunpack.c.h.s8.bf16 %v780_v59  ;;  %v798_v59 = vld [vmem:[#allocation14 + $0xe8] sm:$0xff] }
 0x392   :  { %v764_v11 = vadd.f32 %v1637_v3, %v763_v9  ;;  %v1762_v12 = vpop.f32.mrb[11].mxu1  ;;  %v767_v15 = vmax.f32 %v761_v5, 0.0  ;;  %v841_v3 = vunpack.c.l.s8.bf16 %v777_v1  ;;  %v858_v5 = vunpack.c.h.s8.bf16 %v778_v58  ;;  %v794_v9 = vld [vmem:[#allocation14 + $0xc8] sm:$0xff] }
 0x393   :  { %v857_v12 = vunpack.c.h.s8.bf16 %v777_v1  ;;  %v874_v14 = vunpack.c.l.s8.bf16 %v794_v9 }
 0x394   :  { %v768_v16 = vmax.f32 %v764_v11, 0.0  ;;  %v796_v11 = vld [vmem:[#allocation14 + $0xd8] sm:$0xff] }
 0x395   :  { %v892_v22 = vunpack.c.h.s8.bf16 %v796_v11 }
 0x396   :  { %v2366_v19 = vpack.c.bf16 %v768_v16, %v767_v15  ;;  %v876_v15 = vunpack.c.l.s8.bf16 %v796_v11  ;;  %v793_v16 = vld [vmem:[#allocation14 + $0xc0] sm:$0xff]  ;;  %v814_v11 = vld [vmem:[#allocation14 + $0x168] sm:$0xff] }
 0x398   :  { %995 = vmatmul.mubr.bf16.vlgmr.msra.gmra.mrb[12].mxu0 %v2366_v19  ;;  %1038 = vmatmul.mubr.bf16.vlgmr.msra.gmra.mrb[12].mxu1 %v2366_v19 }
 0x399   :  { %1049 = vmatpush1.bf16.msra.mxu0 %v837_v17  ;;  %1092 = vmatpush1.bf16.msra.mxu1 %v839_v18  ;;  %v795_v17 = vld [vmem:[#allocation14 + $0xd0] sm:$0xff]  ;;  %v873_v18 = vunpack.c.l.s8.bf16 %v793_v16 }
 0x39a   :  { %1050 = vmatprep.subr.bf16.mxu0 %v854_v20  ;;  %1093 = vmatprep.subr.bf16.mxu1 %v856_v21  ;;  %v875_v20 = vunpack.c.l.s8.bf16 %v795_v17  ;;  %v890_v21 = vunpack.c.h.s8.bf16 %v794_v9 }
 0x39b   :  { %1080 = vmatprep.mubr.bf16.mxu0 %v2094_v0  ;;  %1123 = vmatprep.mubr.bf16.mxu1 %v2094_v0 }
 0x39d   :  { %1051 = vmatpush1.bf16.msra.mxu0 %v853_v24  ;;  %1094 = vmatpush1.bf16.msra.mxu1 %v855_v25  ;;  %v812_v24 = vld [vmem:[#allocation14 + $0x158] sm:$0xff]  ;;  %v889_v25 = vunpack.c.h.s8.bf16 %v793_v16 }
 0x39e   :  { %1052 = vmatprep.subr.bf16.mxu0 %v870_v26  ;;  %1095 = vmatprep.subr.bf16.mxu1 %v872_v27  ;;  %v891_v26 = vunpack.c.h.s8.bf16 %v795_v17  ;;  %v906_v27 = vunpack.c.l.s8.bf16 %v810_v23  ;;  %v908_v28 = vunpack.c.l.s8.bf16 %v812_v24  ;;  %v924_v34 = vunpack.c.h.s8.bf16 %v812_v24  ;;  %v813_v17 = vld [vmem:[#allocation14 + $0x160] sm:$0xff]  ;;  %v832_v24 = vld [vmem:[#allocation14 + $0x1f8] sm:$0xff] }
 0x3a1   :  { %1053 = vmatpush1.bf16.msra.mxu0 %v869_v30  ;;  %1096 = vmatpush1.bf16.msra.mxu1 %v871_v31  ;;  %v811_v30 = vld [vmem:[#allocation14 + $0x150] sm:$0xff]  ;;  %v905_v31 = vunpack.c.l.s8.bf16 %v809_v29 }
 0x3a2   :  { %1054 = vmatprep.subr.bf16.mxu0 %v886_v32  ;;  %1097 = vmatprep.subr.bf16.mxu1 %v888_v33  ;;  %v907_v32 = vunpack.c.l.s8.bf16 %v811_v30  ;;  %v922_v33 = vunpack.c.h.s8.bf16 %v810_v23  ;;  %v830_v23 = vld [vmem:[#allocation14 + $0x1e8] sm:$0xff] }
 0x3a5   :  { %1055 = vmatpush1.bf16.msra.mxu0 %v885_v36  ;;  %1098 = vmatpush1.bf16.msra.mxu1 %v887_v37  ;;  %v828_v36 = vld [vmem:[#allocation14 + $0x1d8] sm:$0xff]  ;;  %v921_v37 = vunpack.c.h.s8.bf16 %v809_v29  ;;  %v829_v29 = vld [vmem:[#allocation14 + $0x1e0] sm:$0xff] }
 0x3a6   :  { %1056 = vmatprep.subr.bf16.mxu0 %v902_v38  ;;  %1099 = vmatprep.subr.bf16.mxu1 %v904_v39  ;;  %v923_v38 = vunpack.c.h.s8.bf16 %v811_v30  ;;  %v938_v39 = vunpack.c.l.s8.bf16 %v826_v35  ;;  %v940_v40 = vunpack.c.l.s8.bf16 %v828_v36  ;;  %v956_v46 = vunpack.c.h.s8.bf16 %v828_v36  ;;  %v831_v30 = vld [vmem:[#allocation14 + $0x1f0] sm:$0xff] }
 0x3a7   :  { %v959_v36 = vunpack.c.h.s8.bf16 %v831_v30 }
 0x3a9   :  { %1057 = vmatpush1.bf16.msra.mxu0 %v901_v42  ;;  %1100 = vmatpush1.bf16.msra.mxu1 %v903_v43  ;;  %v827_v42 = vld [vmem:[#allocation14 + $0x1d0] sm:$0xff]  ;;  %v937_v43 = vunpack.c.l.s8.bf16 %v825_v41 }
 0x3aa   :  { %1058 = vmatprep.subr.bf16.mxu0 %v918_v44  ;;  %1101 = vmatprep.subr.bf16.mxu1 %v920_v45  ;;  %v939_v44 = vunpack.c.l.s8.bf16 %v827_v42  ;;  %v954_v45 = vunpack.c.h.s8.bf16 %v826_v35  ;;  %v957_v35 = vunpack.c.h.s8.bf16 %v829_v29 }
 0x3ad   :  { %1059 = vmatpush1.bf16.msra.mxu0 %v917_v48  ;;  %1102 = vmatpush1.bf16.msra.mxu1 %v919_v49  ;;  %v784_v48 = vld [vmem:[#allocation14 + $0x78] sm:$0xff]  ;;  %v953_v49 = vunpack.c.h.s8.bf16 %v825_v41 }
 0x3ae   :  { %1060 = vmatprep.subr.bf16.mxu0 %v934_v50  ;;  %1103 = vmatprep.subr.bf16.mxu1 %v936_v51  ;;  %v955_v50 = vunpack.c.h.s8.bf16 %v827_v42  ;;  %v846_v51 = vunpack.c.l.s8.bf16 %v782_v47  ;;  %v848_v52 = vunpack.c.l.s8.bf16 %v784_v48  ;;  %v864_v58 = vunpack.c.h.s8.bf16 %v784_v48 }
 0x3b1   :  { %1061 = vmatpush1.bf16.msra.mxu0 %v933_v54  ;;  %1104 = vmatpush1.bf16.msra.mxu1 %v935_v55  ;;  %v783_v54 = vld [vmem:[#allocation14 + $0x70] sm:$0xff]  ;;  %v845_v55 = vunpack.c.l.s8.bf16 %v781_v53 }
 0x3b2   :  { %1062 = vmatprep.subr.bf16.mxu0 %v950_v56  ;;  %1105 = vmatprep.subr.bf16.mxu1 %v952_v57  ;;  %v847_v56 = vunpack.c.l.s8.bf16 %v783_v54  ;;  %v862_v57 = vunpack.c.h.s8.bf16 %v782_v47 }
 0x3b5   :  { %1063 = vmatpush1.bf16.msra.mxu0 %v949_v60  ;;  %1106 = vmatpush1.bf16.msra.mxu1 %v951_v61  ;;  %v800_v60 = vld [vmem:[#allocation14 + $0xf8] sm:$0xff]  ;;  %v861_v61 = vunpack.c.h.s8.bf16 %v781_v53 }
 0x3b6   :  { %1134 = vmatprep.subr.bf16.mxu0 %v842_v62  ;;  %1177 = vmatprep.subr.bf16.mxu1 %v844_v63  ;;  %v863_v62 = vunpack.c.h.s8.bf16 %v783_v54  ;;  %v878_v63 = vunpack.c.l.s8.bf16 %v798_v59  ;;  %v880_v1 = vunpack.c.l.s8.bf16 %v800_v60  ;;  %v896_v9 = vunpack.c.h.s8.bf16 %v800_v60 }
 0x3b8   :  { %1081 = vmatmul.mubr.bf16.vlgmr.msra.gmra.mrb[16].mxu0 %v2366_v19  ;;  %1124 = vmatmul.mubr.bf16.vlgmr.msra.gmra.mrb[16].mxu1 %v2366_v19 }
 0x3b9   :  { %1135 = vmatpush1.bf16.msra.mxu0 %v841_v3  ;;  %1178 = vmatpush1.bf16.msra.mxu1 %v843_v4  ;;  %v799_v3 = vld [vmem:[#allocation14 + $0xf0] sm:$0xff]  ;;  %v877_v4 = vunpack.c.l.s8.bf16 %v797_v2 }
 0x3ba   :  { %1136 = vmatprep.subr.bf16.mxu0 %v858_v5  ;;  %1179 = vmatprep.subr.bf16.mxu1 %v860_v6  ;;  %v879_v5 = vunpack.c.l.s8.bf16 %v799_v3  ;;  %v894_v6 = vunpack.c.h.s8.bf16 %v798_v59 }
 0x3bb   :  { %1166 = vmatprep.mubr.bf16.mxu0 %v2094_v0  ;;  %1209 = vmatprep.mubr.bf16.mxu1 %v2094_v0 }
 0x3bd   :  { %1137 = vmatpush1.bf16.msra.mxu0 %v857_v12  ;;  %1180 = vmatpush1.bf16.msra.mxu1 %v859_v13  ;;  %v816_v12 = vld [vmem:[#allocation14 + $0x178] sm:$0xff]  ;;  %v893_v13 = vunpack.c.h.s8.bf16 %v797_v2 }
 0x3be   :  { %1138 = vmatprep.subr.bf16.mxu0 %v874_v14  ;;  %1181 = vmatprep.subr.bf16.mxu1 %v876_v15  ;;  %v895_v14 = vunpack.c.h.s8.bf16 %v799_v3  ;;  %v910_v15 = vunpack.c.l.s8.bf16 %v814_v11  ;;  %v912_v16 = vunpack.c.l.s8.bf16 %v816_v12 }
 0x3c1   :  { %1139 = vmatpush1.bf16.msra.mxu0 %v873_v18  ;;  %1182 = vmatpush1.bf16.msra.mxu1 %v875_v20  ;;  %v909_v18 = vunpack.c.l.s8.bf16 %v813_v17 }
 0x3c2   :  { %1140 = vmatprep.subr.bf16.mxu0 %v890_v21  ;;  %1183 = vmatprep.subr.bf16.mxu1 %v892_v22  ;;  %v926_v21 = vunpack.c.h.s8.bf16 %v814_v11  ;;  %v928_v22 = vunpack.c.h.s8.bf16 %v816_v12 }
 0x3c5   :  { %1141 = vmatpush1.bf16.msra.mxu0 %v889_v25  ;;  %1184 = vmatpush1.bf16.msra.mxu1 %v891_v26  ;;  %v925_v25 = vunpack.c.h.s8.bf16 %v813_v17 }
 0x3c6   :  { %1142 = vmatprep.subr.bf16.mxu0 %v906_v27  ;;  %1185 = vmatprep.subr.bf16.mxu1 %v908_v28  ;;  %v942_v27 = vunpack.c.l.s8.bf16 %v830_v23  ;;  %v944_v28 = vunpack.c.l.s8.bf16 %v832_v24 }
 0x3c9   :  { %1143 = vmatpush1.bf16.msra.mxu0 %v905_v31  ;;  %1186 = vmatpush1.bf16.msra.mxu1 %v907_v32  ;;  %v941_v31 = vunpack.c.l.s8.bf16 %v829_v29  ;;  %v943_v32 = vunpack.c.l.s8.bf16 %v831_v30 }
 0x3ca   :  { %1144 = vmatprep.subr.bf16.mxu0 %v922_v33  ;;  %1187 = vmatprep.subr.bf16.mxu1 %v924_v34  ;;  %v958_v33 = vunpack.c.h.s8.bf16 %v830_v23  ;;  %v960_v34 = vunpack.c.h.s8.bf16 %v832_v24 }
 0x3cd   :  { %1145 = vmatpush1.bf16.msra.mxu0 %v921_v37  ;;  %1188 = vmatpush1.bf16.msra.mxu1 %v923_v38 }
 0x3ce   :  { %1146 = vmatprep.subr.bf16.mxu0 %v938_v39  ;;  %1189 = vmatprep.subr.bf16.mxu1 %v940_v40 }
 0x3d1   :  { %1147 = vmatpush1.bf16.msra.mxu0 %v937_v43  ;;  %1190 = vmatpush1.bf16.msra.mxu1 %v939_v44 }
 0x3d2   :  { %1148 = vmatprep.subr.bf16.mxu0 %v954_v45  ;;  %1191 = vmatprep.subr.bf16.mxu1 %v956_v46 }
 0x3d5   :  { %1149 = vmatpush1.bf16.msra.mxu0 %v953_v49  ;;  %1192 = vmatpush1.bf16.msra.mxu1 %v955_v50 }
 0x3d6   :  { %1220 = vmatprep.subr.bf16.mxu0 %v846_v51  ;;  %1263 = vmatprep.subr.bf16.mxu1 %v848_v52 }
 0x3d8   :  { %1167 = vmatmul.mubr.bf16.vlgmr.msra.gmra.mrb[20].mxu0 %v2366_v19  ;;  %1210 = vmatmul.mubr.bf16.vlgmr.msra.gmra.mrb[20].mxu1 %v2366_v19 }
 0x3d9   :  { %1221 = vmatpush1.bf16.msra.mxu0 %v845_v55  ;;  %1264 = vmatpush1.bf16.msra.mxu1 %v847_v56 }
 0x3da   :  { %1222 = vmatprep.subr.bf16.mxu0 %v862_v57  ;;  %1265 = vmatprep.subr.bf16.mxu1 %v864_v58 }
 0x3db   :  { %1252 = vmatprep.mubr.bf16.mxu0 %v2094_v0  ;;  %1295 = vmatprep.mubr.bf16.mxu1 %v2094_v0  ;;  %v815_v0 = vld [vmem:[#allocation14 + $0x170] sm:$0xff] }
 0x3dc   :  { %v911_v20 = vunpack.c.l.s8.bf16 %v815_v0  ;;  %v927_v26 = vunpack.c.h.s8.bf16 %v815_v0 }
 0x3dd   :  { %1223 = vmatpush1.bf16.msra.mxu0 %v861_v61  ;;  %1266 = vmatpush1.bf16.msra.mxu1 %v863_v62 }
 0x3de   :  { %1224 = vmatprep.subr.bf16.mxu0 %v878_v63  ;;  %1267 = vmatprep.subr.bf16.mxu1 %v880_v1 }
 0x3e1   :  { %1225 = vmatpush1.bf16.msra.mxu0 %v877_v4  ;;  %1268 = vmatpush1.bf16.msra.mxu1 %v879_v5 }
 0x3e2   :  { %1226 = vmatprep.subr.bf16.mxu0 %v894_v6  ;;  %1269 = vmatprep.subr.bf16.mxu1 %v896_v9 }
 0x3e5   :  { %1227 = vmatpush1.bf16.msra.mxu0 %v893_v13  ;;  %1270 = vmatpush1.bf16.msra.mxu1 %v895_v14 }
 0x3e6   :  { %1228 = vmatprep.subr.bf16.mxu0 %v910_v15  ;;  %1271 = vmatprep.subr.bf16.mxu1 %v912_v16 }
 0x3e9   :  { %1229 = vmatpush1.bf16.msra.mxu0 %v909_v18  ;;  %1272 = vmatpush1.bf16.msra.mxu1 %v911_v20 }
 0x3ea   :  { %1230 = vmatprep.subr.bf16.mxu0 %v926_v21  ;;  %1273 = vmatprep.subr.bf16.mxu1 %v928_v22 }
 0x3ed   :  { %1231 = vmatpush1.bf16.msra.mxu0 %v925_v25  ;;  %1274 = vmatpush1.bf16.msra.mxu1 %v927_v26 }
 0x3ee   :  { %1232 = vmatprep.subr.bf16.mxu0 %v942_v27  ;;  %1275 = vmatprep.subr.bf16.mxu1 %v944_v28 }
 0x3f1   :  { %1233 = vmatpush1.bf16.msra.mxu0 %v941_v31  ;;  %1276 = vmatpush1.bf16.msra.mxu1 %v943_v32 }
 0x3f2   :  { %1234 = vmatprep.subr.bf16.mxu0 %v958_v33  ;;  %1277 = vmatprep.subr.bf16.mxu1 %v960_v34 }
 0x3f5   :  { %1235 = vmatpush1.bf16.msra.mxu0 %v957_v35  ;;  %1278 = vmatpush1.bf16.msra.mxu1 %v959_v36 }
 0x3f8   :  { %1253 = vmatmul.mubr.bf16.vlgmr.msra.gmra.mrb[24].mxu0 %v2366_v19  ;;  %1296 = vmatmul.mubr.bf16.vlgmr.msra.gmra.mrb[24].mxu1 %v2366_v19 }
 0x3f9   :  { %2031 = shalt.err (!%p2028_p6)
}
 0x3fa   :  { %s2032_s21 = scalar_lea.hbm %s2484_s13, 512 }
 0x3fb   :  { %p2033_p7 = scmp.ne.s32.totalorder %s2484_s13, %s2032_s21  ;;  %p2036_p8 = scmp.lt.u32.totalorder %s2032_s21, %s2484_s13 }
 0x3fd   :  { %p2038_p9 = pnand %p2036_p8, %p2033_p7 }
 0x3ff   :  { %2041 = shalt.err (!%p2038_p9)
}
 0x400   :  { %s2098_s30 = smov 256   ;;  %s2099_s24 = smov 16   ;;  %v2395_v19 = vsub.s32 2, %v2351_v7  ;;  %v1306_v37 = vld [vmem:[%s2480_s9] sm:$0xff]  ;;  %v2401_v38 = vsub.s32 3, %v2351_v7  ;;  %v2415_v12 = vsub.s32 4, %v2351_v7 }
 0x401   :  { %1597 = dma.vmem_to_hbm [thread:$0]  %s1592_s17, 512, %s2484_s13, [#allocation19], %s2098_s30, %s2098_s30, %s2099_s24   ;;  %v1313_v40 = vrot.slane %v1306_v37, %v2354_v8  ;;  %v1317_v42 = vrot.slane %v1306_v37, %v2360_v10  ;;  %v2418_v13 = vsub.s32 6, %v2351_v7  ;;  %v2421_v14 = vsub.s32 5, %v2351_v7 }
 0x402   :  { %v1422_v39 = vld [vmem:[%s2481_s10] sm:$0xff]  ;;  %v1321_v41 = vrot.slane %v1306_v37, %v2395_v19  ;;  %v1325_v43 = vrot.slane %v1306_v37, %v2401_v38  ;;  %v2424_v15 = vsub.s32 7, %v2351_v7  ;;  %v1329_v16 = vrot.slane %v1306_v37, %v2415_v12 }
 0x403   :  { %v1429_v44 = vrot.slane %v1422_v39, %v2354_v8  ;;  %v1437_v45 = vrot.slane %v1422_v39, %v2395_v19  ;;  %v1433_v48 = vrot.slane %v1422_v39, %v2360_v10  ;;  %v1441_v49 = vrot.slane %v1422_v39, %v2401_v38 }
 0x404   :  { %v1337_v17 = vrot.slane %v1306_v37, %v2418_v13  ;;  %v1333_v0 = vrot.slane %v1306_v37, %v2421_v14  ;;  %v1341_v18 = vrot.slane %v1306_v37, %v2424_v15  ;;  %v1445_v20 = vrot.slane %v1422_v39, %v2415_v12 }
 0x405   :  { %v1453_v21 = vrot.slane %v1422_v39, %v2418_v13  ;;  %v1449_v24 = vrot.slane %v1422_v39, %v2421_v14  ;;  %v1457_v25 = vrot.slane %v1422_v39, %v2424_v15 }
 0x46b   :  { %v996_v46 = vpop.f32.mrb[12].mxu0  ;;  %v1039_v47 = vpop.f32.mrb[12].mxu1 }
 0x46c   :  { %v1390_v50 = vmul.f32 %v1313_v40, %v996_v46  ;;  %v1392_v51 = vmul.f32 %v1321_v41, %v1039_v47  ;;  %v998_v52 = vpop.f32.mrb[13].mxu0  ;;  %v1041_v53 = vpop.f32.mrb[13].mxu1 }
 0x46d   :  { %v1391_v54 = vmul.f32 %v1317_v42, %v998_v52  ;;  %v1393_v55 = vmul.f32 %v1325_v43, %v1041_v53  ;;  %v1000_v56 = vpop.f32.mrb[14].mxu0  ;;  %v1043_v57 = vpop.f32.mrb[14].mxu1 }
 0x46e   :  { %v1506_v58 = vadd.f32 %v1429_v44, %v1390_v50  ;;  %v1508_v59 = vadd.f32 %v1437_v45, %v1392_v51  ;;  %v1406_v60 = vmul.f32 %v1313_v40, %v1000_v56  ;;  %v1408_v61 = vmul.f32 %v1321_v41, %v1043_v57  ;;  %v1002_v62 = vpop.f32.mrb[15].mxu0  ;;  %v1045_v63 = vpop.f32.mrb[15].mxu1 }
 0x46f   :  { %v1507_v1 = vadd.f32 %v1433_v48, %v1391_v54  ;;  %v1509_v2 = vadd.f32 %v1441_v49, %v1393_v55  ;;  %v1407_v3 = vmul.f32 %v1317_v42, %v1002_v62  ;;  %v1409_v4 = vmul.f32 %v1325_v43, %v1045_v63 }
 0x470   :  { %1538 = vst [vmem:[#allocation17] sm:$0xff] %v1506_v58  ;;  %1540 = vst [vmem:[#allocation17 + $0x10] sm:$0xff] %v1508_v59  ;;  %v1522_v5 = vadd.f32 %v1429_v44, %v1406_v60  ;;  %v1524_v6 = vadd.f32 %v1437_v45, %v1408_v61 }
 0x471   :  { %1539 = vst [vmem:[#allocation17 + $0x8] sm:$0xff] %v1507_v1  ;;  %1541 = vst [vmem:[#allocation17 + $0x18] sm:$0xff] %v1509_v2  ;;  %v1523_v9 = vadd.f32 %v1433_v48, %v1407_v3  ;;  %v1525_v11 = vadd.f32 %v1441_v49, %v1409_v4  ;;  %v1307_v48 = vld [vmem:[%s2480_s9 + $0x8] sm:$0xff]  ;;  %s2100_s9 = smov [#allocation17]  }
 0x472   :  { %1554 = vst [vmem:[#allocation17 + $0x80] sm:$0xff] %v1522_v5  ;;  %1556 = vst [vmem:[#allocation17 + $0x90] sm:$0xff] %v1524_v6  ;;  %v1423_v49 = vld [vmem:[%s2481_s10 + $0x8] sm:$0xff]  ;;  %v1345_v50 = vrot.slane %v1307_v48, %v2354_v8  ;;  %v1353_v51 = vrot.slane %v1307_v48, %v2395_v19  ;;  %v1349_v52 = vrot.slane %v1307_v48, %v2360_v10  ;;  %s1579_s10 = sshll.u32 %s2100_s9, 4  ;;  %s1580_s10 = int_to_ptr.vmem [resolvable:$true] %s1579_s10 }
 0x473   :  { %1555 = vst [vmem:[#allocation17 + $0x88] sm:$0xff] %v1523_v9  ;;  %1557 = vst [vmem:[#allocation17 + $0x98] sm:$0xff] %v1525_v11  ;;  %v1357_v53 = vrot.slane %v1307_v48, %v2401_v38  ;;  %v1461_v54 = vrot.slane %v1423_v49, %v2354_v8  ;;  %v1469_v55 = vrot.slane %v1423_v49, %v2395_v19  ;;  %s2042_s7 = scalar_lea.vmem %s1580_s10, 4096  ;;  %p2047_p11 = scmp.lt.s32.totalorder %s1580_s10, %s1580_s10 }
 0x474   :  { %v1465_v58 = vrot.slane %v1423_v49, %v2360_v10  ;;  %v1473_v59 = vrot.slane %v1423_v49, %v2401_v38  ;;  %p2043_p10 = scmp.ne.s32.totalorder %s1580_s10, %s2042_s7  ;;  %p2048_p12 = scmp.lt.s32.totalorder %s2042_s7, %s2042_s7 }
 0x476   :  { %p2049_p13 = por %p2048_p12, %p2047_p11 }
 0x478   :  { %p2050_p0 = pnand %p2049_p13, %p2043_p10 }
 0x48b   :  { %v1082_v22 = vpop.f32.mrb[16].mxu0  ;;  %v1125_v23 = vpop.f32.mrb[16].mxu1 }
 0x48c   :  { %v1394_v7 = vmul.f32 %v1329_v16, %v1082_v22  ;;  %v1396_v26 = vmul.f32 %v1337_v17, %v1125_v23  ;;  %v1084_v27 = vpop.f32.mrb[17].mxu0  ;;  %v1127_v28 = vpop.f32.mrb[17].mxu1  ;;  %v1361_v22 = vrot.slane %v1307_v48, %v2415_v12  ;;  %v1369_v23 = vrot.slane %v1307_v48, %v2418_v13 }
 0x48d   :  { %v1395_v29 = vmul.f32 %v1333_v0, %v1084_v27  ;;  %v1397_v30 = vmul.f32 %v1341_v18, %v1127_v28  ;;  %v1086_v31 = vpop.f32.mrb[18].mxu0  ;;  %v1129_v32 = vpop.f32.mrb[18].mxu1 }
 0x48e   :  { %v1510_v33 = vadd.f32 %v1445_v20, %v1394_v7  ;;  %v1512_v34 = vadd.f32 %v1453_v21, %v1396_v26  ;;  %v1410_v35 = vmul.f32 %v1329_v16, %v1086_v31  ;;  %v1412_v36 = vmul.f32 %v1337_v17, %v1129_v32  ;;  %v1088_v37 = vpop.f32.mrb[19].mxu0  ;;  %v1131_v40 = vpop.f32.mrb[19].mxu1 }
 0x48f   :  { %v1511_v41 = vadd.f32 %v1449_v24, %v1395_v29  ;;  %v1513_v42 = vadd.f32 %v1457_v25, %v1397_v30  ;;  %v1411_v43 = vmul.f32 %v1333_v0, %v1088_v37  ;;  %v1413_v44 = vmul.f32 %v1341_v18, %v1131_v40 }
 0x490   :  { %1542 = vst [vmem:[#allocation17 + $0x20] sm:$0xff] %v1510_v33  ;;  %1544 = vst [vmem:[#allocation17 + $0x30] sm:$0xff] %v1512_v34  ;;  %v1526_v39 = vadd.f32 %v1445_v20, %v1410_v35  ;;  %v1528_v45 = vadd.f32 %v1453_v21, %v1412_v36  ;;  %v1477_v7 = vrot.slane %v1423_v49, %v2415_v12 }
 0x491   :  { %1543 = vst [vmem:[#allocation17 + $0x28] sm:$0xff] %v1511_v41  ;;  %1545 = vst [vmem:[#allocation17 + $0x38] sm:$0xff] %v1513_v42  ;;  %v1527_v46 = vadd.f32 %v1449_v24, %v1411_v43  ;;  %v1529_v47 = vadd.f32 %v1457_v25, %v1413_v44  ;;  %v1365_v24 = vrot.slane %v1307_v48, %v2421_v14 }
 0x492   :  { %1558 = vst [vmem:[#allocation17 + $0xa0] sm:$0xff] %v1526_v39  ;;  %1560 = vst [vmem:[#allocation17 + $0xb0] sm:$0xff] %v1528_v45  ;;  %v1373_v25 = vrot.slane %v1307_v48, %v2424_v15  ;;  %v1485_v26 = vrot.slane %v1423_v49, %v2418_v13  ;;  %v1481_v29 = vrot.slane %v1423_v49, %v2421_v14 }
 0x493   :  { %1559 = vst [vmem:[#allocation17 + $0xa8] sm:$0xff] %v1527_v46  ;;  %1561 = vst [vmem:[#allocation17 + $0xb8] sm:$0xff] %v1529_v47  ;;  %v1489_v30 = vrot.slane %v1423_v49, %v2424_v15 }
 0x4ab   :  { %v1168_v56 = vpop.f32.mrb[20].mxu0  ;;  %v1211_v57 = vpop.f32.mrb[20].mxu1 }
 0x4ac   :  { %v1398_v60 = vmul.f32 %v1345_v50, %v1168_v56  ;;  %v1400_v61 = vmul.f32 %v1353_v51, %v1211_v57  ;;  %v1170_v62 = vpop.f32.mrb[21].mxu0  ;;  %v1213_v63 = vpop.f32.mrb[21].mxu1 }
 0x4ad   :  { %v1399_v1 = vmul.f32 %v1349_v52, %v1170_v62  ;;  %v1401_v2 = vmul.f32 %v1357_v53, %v1213_v63  ;;  %v1172_v3 = vpop.f32.mrb[22].mxu0  ;;  %v1215_v4 = vpop.f32.mrb[22].mxu1 }
 0x4ae   :  { %v1514_v5 = vadd.f32 %v1461_v54, %v1398_v60  ;;  %v1516_v6 = vadd.f32 %v1469_v55, %v1400_v61  ;;  %v1414_v9 = vmul.f32 %v1345_v50, %v1172_v3  ;;  %v1416_v8 = vmul.f32 %v1353_v51, %v1215_v4  ;;  %v1174_v11 = vpop.f32.mrb[23].mxu0  ;;  %v1217_v19 = vpop.f32.mrb[23].mxu1 }
 0x4af   :  { %v1515_v16 = vadd.f32 %v1465_v58, %v1399_v1  ;;  %v1517_v17 = vadd.f32 %v1473_v59, %v1401_v2  ;;  %v1415_v0 = vmul.f32 %v1349_v52, %v1174_v11  ;;  %v1417_v10 = vmul.f32 %v1357_v53, %v1217_v19 }
 0x4b0   :  { %1546 = vst [vmem:[#allocation17 + $0x40] sm:$0xff] %v1514_v5  ;;  %1548 = vst [vmem:[#allocation17 + $0x50] sm:$0xff] %v1516_v6  ;;  %v1530_v38 = vadd.f32 %v1461_v54, %v1414_v9  ;;  %v1532_v18 = vadd.f32 %v1469_v55, %v1416_v8 }
 0x4b1   :  { %1547 = vst [vmem:[#allocation17 + $0x48] sm:$0xff] %v1515_v16  ;;  %1549 = vst [vmem:[#allocation17 + $0x58] sm:$0xff] %v1517_v17  ;;  %v1531_v20 = vadd.f32 %v1465_v58, %v1415_v0  ;;  %v1533_v21 = vadd.f32 %v1473_v59, %v1417_v10 }
 0x4b2   :  { %1562 = vst [vmem:[#allocation17 + $0xc0] sm:$0xff] %v1530_v38  ;;  %1564 = vst [vmem:[#allocation17 + $0xd0] sm:$0xff] %v1532_v18 }
 0x4b3   :  { %1563 = vst [vmem:[#allocation17 + $0xc8] sm:$0xff] %v1531_v20  ;;  %1565 = vst [vmem:[#allocation17 + $0xd8] sm:$0xff] %v1533_v21 }
 0x4cb   :  { %v1254_v27 = vpop.f32.mrb[24].mxu0  ;;  %v1297_v28 = vpop.f32.mrb[24].mxu1 }
 0x4cc   :  { %v1402_v31 = vmul.f32 %v1361_v22, %v1254_v27  ;;  %v1404_v32 = vmul.f32 %v1369_v23, %v1297_v28  ;;  %v1256_v33 = vpop.f32.mrb[25].mxu0  ;;  %v1299_v34 = vpop.f32.mrb[25].mxu1 }
 0x4cd   :  { %v1403_v35 = vmul.f32 %v1365_v24, %v1256_v33  ;;  %v1405_v36 = vmul.f32 %v1373_v25, %v1299_v34  ;;  %v1258_v37 = vpop.f32.mrb[26].mxu0  ;;  %v1301_v40 = vpop.f32.mrb[26].mxu1 }
 0x4ce   :  { %v1518_v41 = vadd.f32 %v1477_v7, %v1402_v31  ;;  %v1520_v42 = vadd.f32 %v1485_v26, %v1404_v32  ;;  %v1418_v43 = vmul.f32 %v1361_v22, %v1258_v37  ;;  %v1420_v12 = vmul.f32 %v1369_v23, %v1301_v40  ;;  %v1260_v44 = vpop.f32.mrb[27].mxu0  ;;  %v1303_v13 = vpop.f32.mrb[27].mxu1 }
 0x4cf   :  { %v1519_v39 = vadd.f32 %v1481_v29, %v1403_v35  ;;  %v1521_v14 = vadd.f32 %v1489_v30, %v1405_v36  ;;  %v1419_v45 = vmul.f32 %v1365_v24, %v1260_v44  ;;  %v1421_v15 = vmul.f32 %v1373_v25, %v1303_v13 }
 0x4d0   :  { %1550 = vst [vmem:[#allocation17 + $0x60] sm:$0xff] %v1518_v41  ;;  %1552 = vst [vmem:[#allocation17 + $0x70] sm:$0xff] %v1520_v42  ;;  %v1534_v46 = vadd.f32 %v1477_v7, %v1418_v43  ;;  %v1536_v47 = vadd.f32 %v1485_v26, %v1420_v12 }
 0x4d1   :  { %1551 = vst [vmem:[#allocation17 + $0x68] sm:$0xff] %v1519_v39  ;;  %1553 = vst [vmem:[#allocation17 + $0x78] sm:$0xff] %v1521_v14  ;;  %v1535_v48 = vadd.f32 %v1481_v29, %v1419_v45  ;;  %v1537_v49 = vadd.f32 %v1489_v30, %v1421_v15 }
 0x4d2   :  { %1566 = vst [vmem:[#allocation17 + $0xe0] sm:$0xff] %v1534_v46  ;;  %1568 = vst [vmem:[#allocation17 + $0xf0] sm:$0xff] %v1536_v47 }
 0x4d3   :  { %1567 = vst [vmem:[#allocation17 + $0xe8] sm:$0xff] %v1535_v48  ;;  %1569 = vst [vmem:[#allocation17 + $0xf8] sm:$0xff] %v1537_v49 }
 0x4d4   :  { %2053 = shalt.err (!%p2050_p0)
}
 0x4d5   :  { %s2054_s19 = scalar_lea.hbm %s2483_s12, 4096 }
 0x4d6   :  { %p2055_p1 = scmp.ne.s32.totalorder %s2483_s12, %s2054_s19  ;;  %p2058_p2 = scmp.lt.u32.totalorder %s2054_s19, %s2483_s12 }
 0x4d8   :  { %p2060_p3 = pnand %p2058_p2, %p2055_p1 }
 0x4da   :  { %2063 = shalt.err (!%p2060_p3)
}
 0x4db   :  { %1585 = dma.vmem_to_hbm [thread:$0]  %s1580_s10, 4096, %s2483_s12, [#allocation4], %s2086_s6, %s2086_s6, %s2079_s18  }
 0x4dc   :  { %2074 = dma.done.wait [#allocation4], 4096  }
 0x4dd   :  { %2075 = vsyncadd [#allocation4], 4294963200 }
 0x4de   :  { %2076 = dma.done.wait [#allocation19], 512  }
 0x4df   :  { %2077 = vsyncadd [#allocation19], 4294966784 }
 0x4e0   :  { %1604 = vsyncpa [#allocation3], 1 }
 0x4e1   :  { %1605 = vsyncpa [#allocation6], 1 }
 0x4e2   :  { %1606 = vsyncpa [#allocation9], 1 }
 0x4e3   :  { %1607 = vsyncpa [#allocation12], 1 }
 0x4e4   :  { %1608 = vsyncpa [#allocation15], 1 }
 0x4e5   :  { %1609 = vsyncpa [#allocation4], 1 }
 0x4e6   :  { %1610 = vsyncpa [#allocation19], 1 }

</bundles_post_ra>
